<compile_context>
chip_gen: v7x
topology: tpu7x:2x2x1
jax: 0.10.0
libtpu: 0.0.40
codegen_flags: <defaults>
</compile_context>

<pallas_src>
import jax
import jax.numpy as jnp
from jax import lax
from jax.experimental import pallas as pl
from jax.experimental.pallas import tpu as pltpu


# ---------------------------------------------------------------------------
# Kernel
# ---------------------------------------------------------------------------
def _up_kernel(x1_ref, x2_ref, g_ref, brow_ref, t1u_ref, t1x_ref, s1_ref,
               b1_ref, t2_ref, s2_ref, b2_ref, o_ref, up_ref, acc1_ref,
               acc2_ref):
    # x1_ref : (1, H1, W1*C1)    low-res input, slab layout
    # x2_ref : (1, H2, W2*C2)    skip connection, slab layout (H2=2*H1)
    # g_ref  : (2, W1*C1, W2*Cu) transpose-conv, one block-diag mat per row parity
    # brow   : (1, W2*Cu)        transpose-conv bias tiled across W
    # t1u/t1x: (3, W2*Cu, W2*Cmid) / (3, W2*C2, W2*Cmid)  conv1 banded weights
    # t2     : (3, W2*Cmid, W2*Cout)                      conv2 banded weights
    # s*/b*  : (1, W2*C)         folded BN scale/shift tiled across W
    # o_ref  : (1, H2, W2*Cout)  lane-dense output slab
    f32 = jnp.float32
    H2 = x2_ref.shape[1]
    w2cu = up_ref.shape[2]

    # ---- 1. ConvTranspose2d(k=2, s=2): one matmul per output-row parity ----
    x1s = x1_ref[0]                                   # (H1, W1*C1)
    brow = brow_ref[...]                              # (1, W2*Cu)
    up_ref[:, 0, :] = jnp.dot(x1s, g_ref[0], preferred_element_type=f32) + brow
    up_ref[:, 1, :] = jnp.dot(x1s, g_ref[1], preferred_element_type=f32) + brow
    # (H1, 2, W2*Cu) -> (H2, W2*Cu): interleave even/odd rows (minor dim fixed).
    u = up_ref[...].reshape(H2, w2cu)
    x2s = x2_ref[0]                                   # (H2, W2*C2)

    # ---- 2. conv1 (3x3, pad 1): 3 row-banded matmuls per input slab --------
    # Channel concat [up | x2] is folded into (t1u, t1x); column padding is in
    # the band structure; row padding = the row-range restrictions below.
    acc1_ref[...] = (
        jnp.dot(u, t1u_ref[1], preferred_element_type=f32)
        + jnp.dot(x2s, t1x_ref[1], preferred_element_type=f32))
    acc1_ref[1:H2, :] += (
        jnp.dot(u[:H2 - 1], t1u_ref[0], preferred_element_type=f32)
        + jnp.dot(x2s[:H2 - 1], t1x_ref[0], preferred_element_type=f32))
    acc1_ref[:H2 - 1, :] += (
        jnp.dot(u[1:], t1u_ref[2], preferred_element_type=f32)
        + jnp.dot(x2s[1:], t1x_ref[2], preferred_element_type=f32))
    # BN1 (eval mode, folded) + ReLU.
    y1 = jnp.maximum(acc1_ref[...] * s1_ref[...] + b1_ref[...], 0.0)

    # ---- 3. conv2 (3x3, pad 1): 3 row-banded matmuls ------------------------
    acc2_ref[...] = jnp.dot(y1, t2_ref[1], preferred_element_type=f32)
    acc2_ref[1:H2, :] += jnp.dot(y1[:H2 - 1], t2_ref[0],
                                 preferred_element_type=f32)
    acc2_ref[:H2 - 1, :] += jnp.dot(y1[1:], t2_ref[2],
                                    preferred_element_type=f32)
    # BN2 + ReLU, lane-dense (W2*Cout lanes) store.
    o_ref[0] = jnp.maximum(acc2_ref[...] * s2_ref[...] + b2_ref[...], 0.0)


# ---------------------------------------------------------------------------
# Parameter construction / packing
# ---------------------------------------------------------------------------
def make_params(key, in_channels, out_channels, eps=1e-5):
    """Random parameters in PyTorch layouts for Up(in_channels, out_channels)."""
    C1 = in_channels
    Cu = in_channels // 2          # ConvTranspose2d output channels
    Cmid = out_channels            # Convolution default: mid = out
    Cout = out_channels
    ks = jax.random.split(key, 12)
    p = {
        # Upscale: ConvTranspose2d(C1, Cu, kernel_size=2, stride=2) (with bias)
        "wt": jax.random.normal(ks[0], (C1, Cu, 2, 2), jnp.float32) * 0.2,
        "bt": jax.random.normal(ks[1], (Cu,), jnp.float32) * 0.1,
        # Convolution: Conv2d(C1, Cmid, 3, pad=1, bias=False) x2 + BN params
        "w1": jax.random.normal(ks[2], (Cmid, C1, 3, 3), jnp.float32) * 0.15,
        "w2": jax.random.normal(ks[3], (Cout, Cmid, 3, 3), jnp.float32) * 0.15,
        "g1": jax.random.uniform(ks[4], (Cmid,), jnp.float32, 0.5, 1.5),
        "beta1": jax.random.normal(ks[5], (Cmid,), jnp.float32) * 0.1,
        "m1": jax.random.normal(ks[6], (Cmid,), jnp.float32) * 0.1,
        "v1": jax.random.uniform(ks[7], (Cmid,), jnp.float32, 0.5, 1.5),
        "g2": jax.random.uniform(ks[8], (Cout,), jnp.float32, 0.5, 1.5),
        "beta2": jax.random.normal(ks[9], (Cout,), jnp.float32) * 0.1,
        "m2": jax.random.normal(ks[10], (Cout,), jnp.float32) * 0.1,
        "v2": jax.random.uniform(ks[11], (Cout,), jnp.float32, 0.5, 1.5),
        "eps": eps,
    }
    return p


def _fold_bn(gamma, beta, mean, var, eps):
    s = gamma / jnp.sqrt(var + eps)
    return s, beta - mean * s


def _band_weights(w_t, W):
    """3x3 conv (pad=1) -> three banded matrices T[ky] of shape (W*Ci, W*Co).

    T[ky][j_in*Ci + c, j_out*Co + o] = w_t[o, c, ky, kx] with kx = j_in - j_out + 1
    (block-tridiagonal; column zero-padding is implicit in the band).
    """
    mats = []
    for ky in range(3):
        T = 0.0
        for kx in range(3):
            S = jnp.eye(W, k=1 - kx, dtype=jnp.float32)      # S[j_in, j_out]
            M = jnp.transpose(w_t[:, :, ky, kx])             # (Ci, Co)
            T = T + jnp.kron(S, M)
        mats.append(T)
    return jnp.stack(mats, axis=0)                           # (3, W*Ci, W*Co)


def _upsample_weights(wt_t, W1):
    """ConvTranspose2d(k=2, s=2) -> two block-diagonal (W1*C1, W2*Cu) matrices,
    one per output-row parity; output columns ordered ((2*j+dx)*Cu + o)."""
    C1, Cu = wt_t.shape[0], wt_t.shape[1]
    eye = jnp.eye(W1, dtype=jnp.float32)
    mats = []
    for dy in range(2):
        P = jnp.transpose(wt_t[:, :, dy, :], (0, 2, 1)).reshape(C1, 2 * Cu)
        mats.append(jnp.kron(eye, P))
    return jnp.stack(mats, axis=0)                           # (2, W1*C1, W2*Cu)


def pack_params(p, W2):
    """Pack PyTorch-layout params into the slab/banded layout used by the kernel."""
    W1 = W2 // 2
    Cu = p["wt"].shape[1]
    s1, b1 = _fold_bn(p["g1"], p["beta1"], p["m1"], p["v1"], p["eps"])
    s2, b2 = _fold_bn(p["g2"], p["beta2"], p["m2"], p["v2"], p["eps"])

    g = _upsample_weights(p["wt"], W1)                       # (2, W1*C1, W2*Cu)
    brow = jnp.tile(p["bt"], W2).reshape(1, W2 * Cu)
    # Split conv1 input channels: [0,Cu) act on the upsampled slab, [Cu,C1) on x2.
    t1u = _band_weights(p["w1"][:, :Cu, :, :], W2)           # (3, W2*Cu,  W2*Cmid)
    t1x = _band_weights(p["w1"][:, Cu:, :, :], W2)           # (3, W2*C2,  W2*Cmid)
    t2 = _band_weights(p["w2"], W2)                          # (3, W2*Cmid, W2*Cout)
    s1r = jnp.tile(s1, W2).reshape(1, -1)
    b1r = jnp.tile(b1, W2).reshape(1, -1)
    s2r = jnp.tile(s2, W2).reshape(1, -1)
    b2r = jnp.tile(b2, W2).reshape(1, -1)
    return (g, brow, t1u, t1x, s1r, b1r, t2, s2r, b2r)


# ---------------------------------------------------------------------------
# Forward wrappers
# ---------------------------------------------------------------------------
def up_forward(x1_nchw, x2_nchw, packed):
    g, brow, t1u, t1x, s1r, b1r, t2, s2r, b2r = packed
    B, C1, H1, W1 = x1_nchw.shape
    _, C2, H2, W2 = x2_nchw.shape
    Cu = brow.shape[1] // W2
    Cmid = s1r.shape[1] // W2
    Cout = s2r.shape[1] // W2

    # NCHW -> NHWC -> lane-dense (B, H, W*C) slabs (the reshape is free in XLA;
    # no jnp.pad / no extra full-array HBM pass before the kernel).
    x1s = jnp.transpose(x1_nchw, (0, 2, 3, 1)).reshape(B, H1, W1 * C1)
    x1s = x1s.astype(jnp.float32)
    x2s = jnp.transpose(x2_nchw, (0, 2, 3, 1)).reshape(B, H2, W2 * C2)
    x2s = x2s.astype(jnp.float32)

    flops = 2 * B * (H1 * W1 * C1 * 4 * Cu
                     + H2 * W2 * 9 * (C1 * Cmid + Cmid * Cout))
    bytes_accessed = 4 * (x1s.size + x2s.size + B * H2 * W2 * Cout
                          + g.size + brow.size + t1u.size + t1x.size
                          + t2.size + s1r.size + b1r.size + s2r.size
                          + b2r.size)

    out_slab = pl.pallas_call(
        _up_kernel,
        out_shape=jax.ShapeDtypeStruct((B, H2, W2 * Cout), jnp.float32),
        grid_spec=pltpu.PrefetchScalarGridSpec(
            num_scalar_prefetch=0,
            grid=(B,),
            in_specs=[
                pl.BlockSpec((1, H1, W1 * C1), lambda b: (b, 0, 0)),
                pl.BlockSpec((1, H2, W2 * C2), lambda b: (b, 0, 0)),
                pl.BlockSpec(g.shape, lambda b: (0, 0, 0)),
                pl.BlockSpec(brow.shape, lambda b: (0, 0)),
                pl.BlockSpec(t1u.shape, lambda b: (0, 0, 0)),
                pl.BlockSpec(t1x.shape, lambda b: (0, 0, 0)),
                pl.BlockSpec(s1r.shape, lambda b: (0, 0)),
                pl.BlockSpec(b1r.shape, lambda b: (0, 0)),
                pl.BlockSpec(t2.shape, lambda b: (0, 0, 0)),
                pl.BlockSpec(s2r.shape, lambda b: (0, 0)),
                pl.BlockSpec(b2r.shape, lambda b: (0, 0)),
            ],
            out_specs=pl.BlockSpec((1, H2, W2 * Cout), lambda b: (b, 0, 0)),
            scratch_shapes=[
                pltpu.VMEM((H1, 2, W2 * Cu), jnp.float32),   # upsample interleave
                pltpu.VMEM((H2, W2 * Cmid), jnp.float32),    # conv1 accumulator
                pltpu.VMEM((H2, W2 * Cout), jnp.float32),    # conv2 accumulator
            ],
        ),
        compiler_params=pltpu.CompilerParams(
            dimension_semantics=("parallel",)),
        cost_estimate=pl.CostEstimate(
            flops=flops, transcendentals=0, bytes_accessed=bytes_accessed),
    )(x1s, x2s, g, brow, t1u, t1x, s1r, b1r, t2, s2r, b2r)

    out = out_slab.reshape(B, H2, W2, Cout)
    return jnp.transpose(out, (0, 3, 1, 2))                  # NHWC -> NCHW


def reference_forward(x1_nchw, x2_nchw, p):
    """Pure-JAX reference (lax conv) for correctness checking."""
    x1 = jnp.transpose(x1_nchw, (0, 2, 3, 1)).astype(jnp.float32)
    x2 = jnp.transpose(x2_nchw, (0, 2, 3, 1)).astype(jnp.float32)
    B, H1, W1, _ = x1.shape
    Cu = p["wt"].shape[1]

    # ConvTranspose2d(k=2, s=2) with bias.
    taps = jnp.einsum("bhwc,coyx->bhywxo", x1, p["wt"],
                      precision=lax.Precision.HIGHEST)
    up = taps.reshape(B, 2 * H1, 2 * W1, Cu) + p["bt"]

    xin = jnp.concatenate([up, x2], axis=-1)
    s1, b1 = _fold_bn(p["g1"], p["beta1"], p["m1"], p["v1"], p["eps"])
    s2, b2 = _fold_bn(p["g2"], p["beta2"], p["m2"], p["v2"], p["eps"])

    def conv3x3(x, w_t):                      # w_t in torch layout (Co, Ci, 3, 3)
        k = jnp.transpose(w_t, (2, 3, 1, 0))  # HWIO
        return lax.conv_general_dilated(
            x, k, window_strides=(1, 1), padding=((1, 1), (1, 1)),
            dimension_numbers=("NHWC", "HWIO", "NHWC"),
            precision=lax.Precision.HIGHEST)

    y = jnp.maximum(conv3x3(xin, p["w1"]) * s1 + b1, 0.0)
    y = jnp.maximum(conv3x3(y, p["w2"]) * s2 + b2, 0.0)
    return jnp.transpose(y, (0, 3, 1, 2))


# ---------------------------------------------------------------------------
if __name__ == "__main__":
    key = jax.random.PRNGKey(0)
    k1, k2, kp = jax.random.split(key, 3)

    # Up(in_channels=8, out_channels=8):
    #   x1: (B, 8, 8, 8)  -> upsampled to (B, 4, 16, 16)
    #   x2: (B, 4, 16, 16); concat -> (B, 8, 16, 16); output (B, 8, 16, 16)
    B, Cin, Cout = 2, 8, 8
    H1 = W1 = 8
    x1 = jax.random.normal(k1, (B, Cin, H1, W1), jnp.float32)
    x2 = jax.random.normal(k2, (B, Cin // 2, 2 * H1, 2 * W1), jnp.float32)

    params = make_params(kp, Cin, Cout)
    packed = pack_params(params, 2 * W1)

    out = up_forward(x1, x2, packed)
    jax.block_until_ready(out)

    ref = reference_forward(x1, x2, params)
    assert out.shape == (B, Cout, 2 * H1, 2 * W1), out.shape
    max_err = jnp.max(jnp.abs(out - ref))
    assert jnp.allclose(out, ref, atol=2e-3, rtol=2e-3), (
        f"mismatch vs reference (max |err| = {max_err})")

    print("KERNEL_OK")
</pallas_src>

<mosaic_0001>
module attributes {stable_mosaic.version = 11 : i64} {
  func.func @_up_kernel(%arg0: i32, %arg1: memref<1x8x64xf32, #tpu.memory_space<vmem>>, %arg2: memref<1x16x64xf32, #tpu.memory_space<vmem>>, %arg3: memref<2x64x64xf32, #tpu.memory_space<vmem>>, %arg4: memref<1x64xf32, #tpu.memory_space<vmem>>, %arg5: memref<3x64x128xf32, #tpu.memory_space<vmem>>, %arg6: memref<3x64x128xf32, #tpu.memory_space<vmem>>, %arg7: memref<1x128xf32, #tpu.memory_space<vmem>>, %arg8: memref<1x128xf32, #tpu.memory_space<vmem>>, %arg9: memref<3x128x128xf32, #tpu.memory_space<vmem>>, %arg10: memref<1x128xf32, #tpu.memory_space<vmem>>, %arg11: memref<1x128xf32, #tpu.memory_space<vmem>>, %arg12: memref<1x16x128xf32, #tpu.memory_space<vmem>>, %arg13: memref<8x2x64xf32, #tpu.memory_space<vmem>>, %arg14: memref<16x128xf32, #tpu.memory_space<vmem>>, %arg15: memref<16x128xf32, #tpu.memory_space<vmem>>) attributes {dimension_semantics = [#tpu.dimension_semantics<parallel>], iteration_bounds = array<i64: 2>, scalar_prefetch = 0 : i64, scratch_operands = 3 : i64, tpu.core_type = #tpu.core_type<tc>, window_params = [{transform_indices = @transform_0, window_bounds = array<i64: 1, 8, 64>}, {transform_indices = @transform_1, window_bounds = array<i64: 1, 16, 64>}, {pipeline_mode = #tpu.pipeline_mode<synchronous>, transform_indices = @transform_2, window_bounds = array<i64: 2, 64, 64>}, {pipeline_mode = #tpu.pipeline_mode<synchronous>, transform_indices = @transform_3, window_bounds = array<i64: 1, 64>}, {pipeline_mode = #tpu.pipeline_mode<synchronous>, transform_indices = @transform_4, window_bounds = array<i64: 3, 64, 128>}, {pipeline_mode = #tpu.pipeline_mode<synchronous>, transform_indices = @transform_5, window_bounds = array<i64: 3, 64, 128>}, {pipeline_mode = #tpu.pipeline_mode<synchronous>, transform_indices = @transform_6, window_bounds = array<i64: 1, 128>}, {pipeline_mode = #tpu.pipeline_mode<synchronous>, transform_indices = @transform_7, window_bounds = array<i64: 1, 128>}, {pipeline_mode = #tpu.pipeline_mode<synchronous>, transform_indices = @transform_8, window_bounds = array<i64: 3, 128, 128>}, {pipeline_mode = #tpu.pipeline_mode<synchronous>, transform_indices = @transform_9, window_bounds = array<i64: 1, 128>}, {pipeline_mode = #tpu.pipeline_mode<synchronous>, transform_indices = @transform_10, window_bounds = array<i64: 1, 128>}, {transform_indices = @transform_11, window_bounds = array<i64: 1, 16, 128>}]} {
    %c0 = arith.constant 0 : index
    %c0_0 = arith.constant 0 : index
    %c0_1 = arith.constant 0 : index
    %0 = vector.load %arg1[%c0, %c0_0, %c0_1] : memref<1x8x64xf32, #tpu.memory_space<vmem>>, vector<1x8x64xf32>
    %1 = vector.shape_cast %0 : vector<1x8x64xf32> to vector<8x64xf32>
    %c0_2 = arith.constant 0 : index
    %c0_3 = arith.constant 0 : index
    %2 = vector.load %arg4[%c0_2, %c0_3] : memref<1x64xf32, #tpu.memory_space<vmem>>, vector<1x64xf32>
    %c0_4 = arith.constant 0 : index
    %c0_5 = arith.constant 0 : index
    %c0_6 = arith.constant 0 : index
    %3 = vector.load %arg3[%c0_4, %c0_5, %c0_6] : memref<2x64x64xf32, #tpu.memory_space<vmem>>, vector<1x64x64xf32>
    %4 = vector.shape_cast %3 : vector<1x64x64xf32> to vector<64x64xf32>
    %cst = arith.constant dense<0.000000e+00> : vector<8x64xf32>
    %5 = tpu.matmul %1, %4, %cst {dimension_numbers = #tpu.dot_dimension_numbers<[1], [0], [0], [1], [0, 0, 1, 1], [], []>} : vector<8x64xf32>, vector<64x64xf32>, vector<8x64xf32> -> vector<8x64xf32>
    %6 = vector.broadcast %2 : vector<1x64xf32> to vector<8x64xf32>
    %7 = arith.addf %5, %6 : vector<8x64xf32>
    %c0_7 = arith.constant 0 : index
    %c0_8 = arith.constant 0 : index
    %c0_9 = arith.constant 0 : index
    %8 = vector.load %arg13[%c0_7, %c0_8, %c0_9] : memref<8x2x64xf32, #tpu.memory_space<vmem>>, vector<8x1x64xf32>
    %9 = vector.shape_cast %8 : vector<8x1x64xf32> to vector<8x64xf32>
    %10 = vector.shape_cast %7 : vector<8x64xf32> to vector<8x1x64xf32>
    tpu.vector_store %arg13[%c0_7, %c0_8, %c0_9], %10 {strides = array<i32>} : memref<8x2x64xf32, #tpu.memory_space<vmem>>, vector<8x1x64xf32>,
    %c1 = arith.constant 1 : index
    %c0_10 = arith.constant 0 : index
    %c0_11 = arith.constant 0 : index
    %11 = vector.load %arg3[%c1, %c0_10, %c0_11] : memref<2x64x64xf32, #tpu.memory_space<vmem>>, vector<1x64x64xf32>
    %12 = vector.shape_cast %11 : vector<1x64x64xf32> to vector<64x64xf32>
    %cst_12 = arith.constant dense<0.000000e+00> : vector<8x64xf32>
    %13 = tpu.matmul %1, %12, %cst_12 {dimension_numbers = #tpu.dot_dimension_numbers<[1], [0], [0], [1], [0, 0, 1, 1], [], []>} : vector<8x64xf32>, vector<64x64xf32>, vector<8x64xf32> -> vector<8x64xf32>
    %14 = vector.broadcast %2 : vector<1x64xf32> to vector<8x64xf32>
    %15 = arith.addf %13, %14 : vector<8x64xf32>
    %c0_13 = arith.constant 0 : index
    %c1_14 = arith.constant 1 : index
    %c0_15 = arith.constant 0 : index
    %16 = vector.load %arg13[%c0_13, %c1_14, %c0_15] : memref<8x2x64xf32, #tpu.memory_space<vmem>>, vector<8x1x64xf32>
    %17 = vector.shape_cast %16 : vector<8x1x64xf32> to vector<8x64xf32>
    %18 = vector.shape_cast %15 : vector<8x64xf32> to vector<8x1x64xf32>
    tpu.vector_store %arg13[%c0_13, %c1_14, %c0_15], %18 {strides = array<i32>} : memref<8x2x64xf32, #tpu.memory_space<vmem>>, vector<8x1x64xf32>,
    %c0_16 = arith.constant 0 : index
    %c0_17 = arith.constant 0 : index
    %c0_18 = arith.constant 0 : index
    %19 = vector.load %arg13[%c0_16, %c0_17, %c0_18] : memref<8x2x64xf32, #tpu.memory_space<vmem>>, vector<8x2x64xf32>
    %20 = vector.shape_cast %19 : vector<8x2x64xf32> to vector<16x64xf32>
    %c0_19 = arith.constant 0 : index
    %c0_20 = arith.constant 0 : index
    %c0_21 = arith.constant 0 : index
    %21 = vector.load %arg2[%c0_19, %c0_20, %c0_21] : memref<1x16x64xf32, #tpu.memory_space<vmem>>, vector<1x16x64xf32>
    %22 = vector.shape_cast %21 : vector<1x16x64xf32> to vector<16x64xf32>
    %c1_22 = arith.constant 1 : index
    %c0_23 = arith.constant 0 : index
    %c0_24 = arith.constant 0 : index
    %23 = vector.load %arg5[%c1_22, %c0_23, %c0_24] : memref<3x64x128xf32, #tpu.memory_space<vmem>>, vector<1x64x128xf32>
    %24 = vector.shape_cast %23 : vector<1x64x128xf32> to vector<64x128xf32>
    %cst_25 = arith.constant dense<0.000000e+00> : vector<16x128xf32>
    %25 = tpu.matmul %20, %24, %cst_25 {dimension_numbers = #tpu.dot_dimension_numbers<[1], [0], [0], [1], [0, 0, 1, 1], [], []>} : vector<16x64xf32>, vector<64x128xf32>, vector<16x128xf32> -> vector<16x128xf32>
    %c1_26 = arith.constant 1 : index
    %c0_27 = arith.constant 0 : index
    %c0_28 = arith.constant 0 : index
    %26 = vector.load %arg6[%c1_26, %c0_27, %c0_28] : memref<3x64x128xf32, #tpu.memory_space<vmem>>, vector<1x64x128xf32>
    %27 = vector.shape_cast %26 : vector<1x64x128xf32> to vector<64x128xf32>
    %cst_29 = arith.constant dense<0.000000e+00> : vector<16x128xf32>
    %28 = tpu.matmul %22, %27, %cst_29 {dimension_numbers = #tpu.dot_dimension_numbers<[1], [0], [0], [1], [0, 0, 1, 1], [], []>} : vector<16x64xf32>, vector<64x128xf32>, vector<16x128xf32> -> vector<16x128xf32>
    %29 = arith.addf %25, %28 : vector<16x128xf32>
    %c0_30 = arith.constant 0 : index
    %c0_31 = arith.constant 0 : index
    %30 = vector.load %arg14[%c0_30, %c0_31] : memref<16x128xf32, #tpu.memory_space<vmem>>, vector<16x128xf32>
    tpu.vector_store %arg14[%c0_30, %c0_31], %29 {strides = array<i32>} : memref<16x128xf32, #tpu.memory_space<vmem>>, vector<16x128xf32>,
    %c1_32 = arith.constant 1 : index
    %c0_33 = arith.constant 0 : index
    %31 = vector.load %arg14[%c1_32, %c0_33] : memref<16x128xf32, #tpu.memory_space<vmem>>, vector<15x128xf32>
    %32 = vector.extract_strided_slice %20 {offsets = [0, 0], sizes = [15, 64], strides = [1, 1]} : vector<16x64xf32> to vector<15x64xf32>
    %c0_34 = arith.constant 0 : index
    %c0_35 = arith.constant 0 : index
    %c0_36 = arith.constant 0 : index
    %33 = vector.load %arg5[%c0_34, %c0_35, %c0_36] : memref<3x64x128xf32, #tpu.memory_space<vmem>>, vector<1x64x128xf32>
    %34 = vector.shape_cast %33 : vector<1x64x128xf32> to vector<64x128xf32>
    %cst_37 = arith.constant dense<0.000000e+00> : vector<15x128xf32>
    %35 = tpu.matmul %32, %34, %cst_37 {dimension_numbers = #tpu.dot_dimension_numbers<[1], [0], [0], [1], [0, 0, 1, 1], [], []>} : vector<15x64xf32>, vector<64x128xf32>, vector<15x128xf32> -> vector<15x128xf32>
    %36 = vector.extract_strided_slice %22 {offsets = [0, 0], sizes = [15, 64], strides = [1, 1]} : vector<16x64xf32> to vector<15x64xf32>
    %c0_38 = arith.constant 0 : index
    %c0_39 = arith.constant 0 : index
    %c0_40 = arith.constant 0 : index
    %37 = vector.load %arg6[%c0_38, %c0_39, %c0_40] : memref<3x64x128xf32, #tpu.memory_space<vmem>>, vector<1x64x128xf32>
    %38 = vector.shape_cast %37 : vector<1x64x128xf32> to vector<64x128xf32>
    %cst_41 = arith.constant dense<0.000000e+00> : vector<15x128xf32>
    %39 = tpu.matmul %36, %38, %cst_41 {dimension_numbers = #tpu.dot_dimension_numbers<[1], [0], [0], [1], [0, 0, 1, 1], [], []>} : vector<15x64xf32>, vector<64x128xf32>, vector<15x128xf32> -> vector<15x128xf32>
    %40 = arith.addf %35, %39 : vector<15x128xf32>
    %41 = arith.addf %31, %40 : vector<15x128xf32>
    %c1_42 = arith.constant 1 : index
    %c0_43 = arith.constant 0 : index
    %42 = vector.load %arg14[%c1_42, %c0_43] : memref<16x128xf32, #tpu.memory_space<vmem>>, vector<15x128xf32>
    tpu.vector_store %arg14[%c1_42, %c0_43], %41 {strides = array<i32>} : memref<16x128xf32, #tpu.memory_space<vmem>>, vector<15x128xf32>,
    %c0_44 = arith.constant 0 : index
    %c0_45 = arith.constant 0 : index
    %43 = vector.load %arg14[%c0_44, %c0_45] : memref<16x128xf32, #tpu.memory_space<vmem>>, vector<15x128xf32>
    %44 = vector.extract_strided_slice %20 {offsets = [1, 0], sizes = [15, 64], strides = [1, 1]} : vector<16x64xf32> to vector<15x64xf32>
    %c2 = arith.constant 2 : index
    %c0_46 = arith.constant 0 : index
    %c0_47 = arith.constant 0 : index
    %45 = vector.load %arg5[%c2, %c0_46, %c0_47] : memref<3x64x128xf32, #tpu.memory_space<vmem>>, vector<1x64x128xf32>
    %46 = vector.shape_cast %45 : vector<1x64x128xf32> to vector<64x128xf32>
    %cst_48 = arith.constant dense<0.000000e+00> : vector<15x128xf32>
    %47 = tpu.matmul %44, %46, %cst_48 {dimension_numbers = #tpu.dot_dimension_numbers<[1], [0], [0], [1], [0, 0, 1, 1], [], []>} : vector<15x64xf32>, vector<64x128xf32>, vector<15x128xf32> -> vector<15x128xf32>
    %48 = vector.extract_strided_slice %22 {offsets = [1, 0], sizes = [15, 64], strides = [1, 1]} : vector<16x64xf32> to vector<15x64xf32>
    %c2_49 = arith.constant 2 : index
    %c0_50 = arith.constant 0 : index
    %c0_51 = arith.constant 0 : index
    %49 = vector.load %arg6[%c2_49, %c0_50, %c0_51] : memref<3x64x128xf32, #tpu.memory_space<vmem>>, vector<1x64x128xf32>
    %50 = vector.shape_cast %49 : vector<1x64x128xf32> to vector<64x128xf32>
    %cst_52 = arith.constant dense<0.000000e+00> : vector<15x128xf32>
    %51 = tpu.matmul %48, %50, %cst_52 {dimension_numbers = #tpu.dot_dimension_numbers<[1], [0], [0], [1], [0, 0, 1, 1], [], []>} : vector<15x64xf32>, vector<64x128xf32>, vector<15x128xf32> -> vector<15x128xf32>
    %52 = arith.addf %47, %51 : vector<15x128xf32>
    %53 = arith.addf %43, %52 : vector<15x128xf32>
    %c0_53 = arith.constant 0 : index
    %c0_54 = arith.constant 0 : index
    %54 = vector.load %arg14[%c0_53, %c0_54] : memref<16x128xf32, #tpu.memory_space<vmem>>, vector<15x128xf32>
    tpu.vector_store %arg14[%c0_53, %c0_54], %53 {strides = array<i32>} : memref<16x128xf32, #tpu.memory_space<vmem>>, vector<15x128xf32>,
    %c0_55 = arith.constant 0 : index
    %c0_56 = arith.constant 0 : index
    %55 = vector.load %arg14[%c0_55, %c0_56] : memref<16x128xf32, #tpu.memory_space<vmem>>, vector<16x128xf32>
    %c0_57 = arith.constant 0 : index
    %c0_58 = arith.constant 0 : index
    %56 = vector.load %arg7[%c0_57, %c0_58] : memref<1x128xf32, #tpu.memory_space<vmem>>, vector<1x128xf32>
    %57 = vector.broadcast %56 : vector<1x128xf32> to vector<16x128xf32>
    %58 = arith.mulf %55, %57 : vector<16x128xf32>
    %c0_59 = arith.constant 0 : index
    %c0_60 = arith.constant 0 : index
    %59 = vector.load %arg8[%c0_59, %c0_60] : memref<1x128xf32, #tpu.memory_space<vmem>>, vector<1x128xf32>
    %60 = vector.broadcast %59 : vector<1x128xf32> to vector<16x128xf32>
    %61 = arith.addf %58, %60 : vector<16x128xf32>
    %cst_61 = arith.constant 0.000000e+00 : f32
    %62 = vector.broadcast %cst_61 : f32 to vector<16x128xf32>
    %63 = arith.maximumf %61, %62 : vector<16x128xf32>
    %c1_62 = arith.constant 1 : index
    %c0_63 = arith.constant 0 : index
    %c0_64 = arith.constant 0 : index
    %64 = vector.load %arg9[%c1_62, %c0_63, %c0_64] : memref<3x128x128xf32, #tpu.memory_space<vmem>>, vector<1x128x128xf32>
    %65 = vector.shape_cast %64 : vector<1x128x128xf32> to vector<128x128xf32>
    %cst_65 = arith.constant dense<0.000000e+00> : vector<16x128xf32>
    %66 = tpu.matmul %63, %65, %cst_65 {dimension_numbers = #tpu.dot_dimension_numbers<[1], [0], [0], [1], [0, 0, 1, 1], [], []>} : vector<16x128xf32>, vector<128x128xf32>, vector<16x128xf32> -> vector<16x128xf32>
    %c0_66 = arith.constant 0 : index
    %c0_67 = arith.constant 0 : index
    %67 = vector.load %arg15[%c0_66, %c0_67] : memref<16x128xf32, #tpu.memory_space<vmem>>, vector<16x128xf32>
    tpu.vector_store %arg15[%c0_66, %c0_67], %66 {strides = array<i32>} : memref<16x128xf32, #tpu.memory_space<vmem>>, vector<16x128xf32>,
    %c1_68 = arith.constant 1 : index
    %c0_69 = arith.constant 0 : index
    %68 = vector.load %arg15[%c1_68, %c0_69] : memref<16x128xf32, #tpu.memory_space<vmem>>, vector<15x128xf32>
    %69 = vector.extract_strided_slice %63 {offsets = [0, 0], sizes = [15, 128], strides = [1, 1]} : vector<16x128xf32> to vector<15x128xf32>
    %c0_70 = arith.constant 0 : index
    %c0_71 = arith.constant 0 : index
    %c0_72 = arith.constant 0 : index
    %70 = vector.load %arg9[%c0_70, %c0_71, %c0_72] : memref<3x128x128xf32, #tpu.memory_space<vmem>>, vector<1x128x128xf32>
    %71 = vector.shape_cast %70 : vector<1x128x128xf32> to vector<128x128xf32>
    %cst_73 = arith.constant dense<0.000000e+00> : vector<15x128xf32>
    %72 = tpu.matmul %69, %71, %cst_73 {dimension_numbers = #tpu.dot_dimension_numbers<[1], [0], [0], [1], [0, 0, 1, 1], [], []>} : vector<15x128xf32>, vector<128x128xf32>, vector<15x128xf32> -> vector<15x128xf32>
    %73 = arith.addf %68, %72 : vector<15x128xf32>
    %c1_74 = arith.constant 1 : index
    %c0_75 = arith.constant 0 : index
    %74 = vector.load %arg15[%c1_74, %c0_75] : memref<16x128xf32, #tpu.memory_space<vmem>>, vector<15x128xf32>
    tpu.vector_store %arg15[%c1_74, %c0_75], %73 {strides = array<i32>} : memref<16x128xf32, #tpu.memory_space<vmem>>, vector<15x128xf32>,
    %c0_76 = arith.constant 0 : index
    %c0_77 = arith.constant 0 : index
    %75 = vector.load %arg15[%c0_76, %c0_77] : memref<16x128xf32, #tpu.memory_space<vmem>>, vector<15x128xf32>
    %76 = vector.extract_strided_slice %63 {offsets = [1, 0], sizes = [15, 128], strides = [1, 1]} : vector<16x128xf32> to vector<15x128xf32>
    %c2_78 = arith.constant 2 : index
    %c0_79 = arith.constant 0 : index
    %c0_80 = arith.constant 0 : index
    %77 = vector.load %arg9[%c2_78, %c0_79, %c0_80] : memref<3x128x128xf32, #tpu.memory_space<vmem>>, vector<1x128x128xf32>
    %78 = vector.shape_cast %77 : vector<1x128x128xf32> to vector<128x128xf32>
    %cst_81 = arith.constant dense<0.000000e+00> : vector<15x128xf32>
    %79 = tpu.matmul %76, %78, %cst_81 {dimension_numbers = #tpu.dot_dimension_numbers<[1], [0], [0], [1], [0, 0, 1, 1], [], []>} : vector<15x128xf32>, vector<128x128xf32>, vector<15x128xf32> -> vector<15x128xf32>
    %80 = arith.addf %75, %79 : vector<15x128xf32>
    %c0_82 = arith.constant 0 : index
    %c0_83 = arith.constant 0 : index
    %81 = vector.load %arg15[%c0_82, %c0_83] : memref<16x128xf32, #tpu.memory_space<vmem>>, vector<15x128xf32>
    tpu.vector_store %arg15[%c0_82, %c0_83], %80 {strides = array<i32>} : memref<16x128xf32, #tpu.memory_space<vmem>>, vector<15x128xf32>,
    %c0_84 = arith.constant 0 : index
    %c0_85 = arith.constant 0 : index
    %82 = vector.load %arg15[%c0_84, %c0_85] : memref<16x128xf32, #tpu.memory_space<vmem>>, vector<16x128xf32>
    %c0_86 = arith.constant 0 : index
    %c0_87 = arith.constant 0 : index
    %83 = vector.load %arg10[%c0_86, %c0_87] : memref<1x128xf32, #tpu.memory_space<vmem>>, vector<1x128xf32>
    %84 = vector.broadcast %83 : vector<1x128xf32> to vector<16x128xf32>
    %85 = arith.mulf %82, %84 : vector<16x128xf32>
    %c0_88 = arith.constant 0 : index
    %c0_89 = arith.constant 0 : index
    %86 = vector.load %arg11[%c0_88, %c0_89] : memref<1x128xf32, #tpu.memory_space<vmem>>, vector<1x128xf32>
    %87 = vector.broadcast %86 : vector<1x128xf32> to vector<16x128xf32>
    %88 = arith.addf %85, %87 : vector<16x128xf32>
    %cst_90 = arith.constant 0.000000e+00 : f32
    %89 = vector.broadcast %cst_90 : f32 to vector<16x128xf32>
    %90 = arith.maximumf %88, %89 : vector<16x128xf32>
    %c0_91 = arith.constant 0 : index
    %c0_92 = arith.constant 0 : index
    %c0_93 = arith.constant 0 : index
    %91 = vector.load %arg12[%c0_91, %c0_92, %c0_93] : memref<1x16x128xf32, #tpu.memory_space<vmem>>, vector<1x16x128xf32>
    %92 = vector.shape_cast %91 : vector<1x16x128xf32> to vector<16x128xf32>
    %93 = vector.shape_cast %90 : vector<16x128xf32> to vector<1x16x128xf32>
    tpu.vector_store %arg12[%c0_91, %c0_92, %c0_93], %93 {strides = array<i32>} : memref<1x16x128xf32, #tpu.memory_space<vmem>>, vector<1x16x128xf32>,
    return
  }
  func.func @transform_0(%arg0: i32) -> (i32, i32, i32) {
    %c0_i32 = arith.constant 0 : i32
    %c0_i32_0 = arith.constant 0 : i32
    %c0_i32_1 = arith.constant 0 : i32
    return %arg0, %c0_i32, %c0_i32_0 : i32, i32, i32
  }
  func.func @transform_1(%arg0: i32) -> (i32, i32, i32) {
    %c0_i32 = arith.constant 0 : i32
    %c0_i32_0 = arith.constant 0 : i32
    %c0_i32_1 = arith.constant 0 : i32
    return %arg0, %c0_i32, %c0_i32_0 : i32, i32, i32
  }
  func.func @transform_2(%arg0: i32) -> (i32, i32, i32) {
    %c0_i32 = arith.constant 0 : i32
    %c0_i32_0 = arith.constant 0 : i32
    %c0_i32_1 = arith.constant 0 : i32
    %c0_i32_2 = arith.constant 0 : i32
    return %c0_i32, %c0_i32_0, %c0_i32_1 : i32, i32, i32
  }
  func.func @transform_3(%arg0: i32) -> (i32, i32) {
    %c0_i32 = arith.constant 0 : i32
    %c0_i32_0 = arith.constant 0 : i32
    %c0_i32_1 = arith.constant 0 : i32
    return %c0_i32, %c0_i32_0 : i32, i32
  }
  func.func @transform_4(%arg0: i32) -> (i32, i32, i32) {
    %c0_i32 = arith.constant 0 : i32
    %c0_i32_0 = arith.constant 0 : i32
    %c0_i32_1 = arith.constant 0 : i32
    %c0_i32_2 = arith.constant 0 : i32
    return %c0_i32, %c0_i32_0, %c0_i32_1 : i32, i32, i32
  }
  func.func @transform_5(%arg0: i32) -> (i32, i32, i32) {
    %c0_i32 = arith.constant 0 : i32
    %c0_i32_0 = arith.constant 0 : i32
    %c0_i32_1 = arith.constant 0 : i32
    %c0_i32_2 = arith.constant 0 : i32
    return %c0_i32, %c0_i32_0, %c0_i32_1 : i32, i32, i32
  }
  func.func @transform_6(%arg0: i32) -> (i32, i32) {
    %c0_i32 = arith.constant 0 : i32
    %c0_i32_0 = arith.constant 0 : i32
    %c0_i32_1 = arith.constant 0 : i32
    return %c0_i32, %c0_i32_0 : i32, i32
  }
  func.func @transform_7(%arg0: i32) -> (i32, i32) {
    %c0_i32 = arith.constant 0 : i32
    %c0_i32_0 = arith.constant 0 : i32
    %c0_i32_1 = arith.constant 0 : i32
    return %c0_i32, %c0_i32_0 : i32, i32
  }
  func.func @transform_8(%arg0: i32) -> (i32, i32, i32) {
    %c0_i32 = arith.constant 0 : i32
    %c0_i32_0 = arith.constant 0 : i32
    %c0_i32_1 = arith.constant 0 : i32
    %c0_i32_2 = arith.constant 0 : i32
    return %c0_i32, %c0_i32_0, %c0_i32_1 : i32, i32, i32
  }
  func.func @transform_9(%arg0: i32) -> (i32, i32) {
    %c0_i32 = arith.constant 0 : i32
    %c0_i32_0 = arith.constant 0 : i32
    %c0_i32_1 = arith.constant 0 : i32
    return %c0_i32, %c0_i32_0 : i32, i32
  }
  func.func @transform_10(%arg0: i32) -> (i32, i32) {
    %c0_i32 = arith.constant 0 : i32
    %c0_i32_0 = arith.constant 0 : i32
    %c0_i32_1 = arith.constant 0 : i32
    return %c0_i32, %c0_i32_0 : i32, i32
  }
  func.func @transform_11(%arg0: i32) -> (i32, i32, i32) {
    %c0_i32 = arith.constant 0 : i32
    %c0_i32_0 = arith.constant 0 : i32
    %c0_i32_1 = arith.constant 0 : i32
    return %arg0, %c0_i32, %c0_i32_0 : i32, i32, i32
  }
}

</mosaic_0001>

<bundles_post_ra>
// kernel: tpu_custom_call.1
= control target key start
LH: loop header
LB: loop body
LE: loop exit
PB: predicated region body
PF: predicated region fallthrough
CT: control target
= control target key end

     0   :  { %s3401_s0 = inlined_call_operand.hbm [shape: f32[2,8,64], index: 0, kind: input, shape index: {}]   ;;  %s3402_s1 = inlined_call_operand.hbm [shape: f32[2,16,64], index: 1, kind: input, shape index: {}]   ;;  %s3403_s2 = inlined_call_operand.hbm [shape: f32[2,64,64], index: 2, kind: input, shape index: {}]   ;;  %s3404_s3 = inlined_call_operand.vmem [shape: f32[1,64], index: 3, kind: input, shape index: {}]   ;;  %s3405_s4 = inlined_call_operand.hbm [shape: f32[3,64,128], index: 4, kind: input, shape index: {}]   ;;  %s3406_s5 = inlined_call_operand.hbm [shape: f32[3,64,128], index: 5, kind: input, shape index: {}]   ;;  %s3407_s6 = inlined_call_operand.vmem [shape: f32[1,128], index: 6, kind: input, shape index: {}]   ;;  %s3408_s7 = inlined_call_operand.vmem [shape: f32[1,128], index: 7, kind: input, shape index: {}]   ;;  %s3409_s8 = inlined_call_operand.hbm [shape: f32[3,128,128], index: 8, kind: input, shape index: {}]   ;;  %s3410_s9 = inlined_call_operand.vmem [shape: f32[1,128], index: 9, kind: input, shape index: {}]   ;;  %s3411_s10 = inlined_call_operand.vmem [shape: f32[1,128], index: 10, kind: input, shape index: {}]   ;;  %s3412_s11 = inlined_call_operand.hbm [shape: f32[2,16,128], index: 11, kind: output, shape index: {}]  }
   0x1   :  { %3419 = sst [smem:[#allocation23_spill]] %s3401_s0 }
   0x2   :  { %3420 = sst [smem:[#allocation24_spill]] %s3403_s2 }
   0x3   :  { %3421 = sst [smem:[#allocation25_spill]] %s3405_s4 }
   0x4   :  { %3422 = sst [smem:[#allocation26_spill]] %s3406_s5 }
   0x5   :  { %3423 = sst [smem:[#allocation27_spill]] %s3410_s9 }
   0x6   :  { %3424 = sst [smem:[#allocation28_spill]] %s3411_s10 }
   0x7   :  { %3425 = sst [smem:[#allocation29_spill]] %s3412_s11 }
   0x8   :  { %16 = vsyncpa [#allocation6], 0 }
   0x9   :  { %18 = vsyncpa [#allocation6 + $0x1], 0 }
   0xa   :  { %19 = vsyncpa [#allocation9], 0 }
   0xb   :  { %21 = vsyncpa [#allocation9 + $0x1], 0 }
   0xc   :  { %22 = vsyncpa [#allocation12], 0 }
   0xd   :  { %23 = vsyncpa [#allocation15], 0 }
   0xe   :  { %24 = vsyncpa [#allocation7], 0 }
   0xf   :  { %26 = vsyncpa [#allocation7 + $0x1], 0  ;;  %s2975_s17 = smov 0   ;;  %s2977_s18 = smov 0  }
  0x10   :  { %s2979_s19 = smov 0   ;;  %s2981_s20 = smov 0  }
  0x11 LB: > { %s2899_s21 = smov [#allocation10]   ;;  %s2996_s23 = sadd.s32 4294967295, %s2897_s20   ;;  %s2897_s20 = sphi %s2981_s20, %s3458_s20   ;;  %s2893_s19 = sphi %s2979_s19, %s3457_s19   ;;  %s2889_s18 = sphi %s2977_s18, %s3456_s18   ;;  %s2885_s17 = sphi %s2975_s17, %s3455_s17  }
  0x12   : > { %s316_s22 = sshll.u32 %s2899_s21, 4  ;;  %p1886_p0 = scmp.ge.s32.totalorder %s2897_s20, 1  ;;  %s3001_s22 = int_to_ptr.vmem [resolvable:$true] %s316_s22 }
  0x13   : > { %p3414_p1 = scmp.eq.s32.totalorder %s2996_s23, 0  ;;  %p304_p2 = scmp.lt.s32.totalorder %s2897_s20, 3 }
  0x14   : > { %s2900_s25 = smov [#allocation11]   ;;  %s2901_s28 = smov [#allocation13]  }
  0x15   : > { %p3003_p3 = pnand %p1886_p0, %p304_p2  ;;  %s332_s26 = sshll.u32 %s2900_s25, 4  ;;  %s3016_s26 = int_to_ptr.vmem [resolvable:$true] %s332_s26 }
  0x16   : > { %s345_s29 = sshll.u32 %s2901_s28, 4  ;;  %s3428_s2 = sld [smem:[#allocation24_spill]]  ;;  %s3018_s29 = int_to_ptr.vmem [resolvable:$true] %s345_s29 }
  0x17   : > { %s3426_s24 = scalar_select %p3003_p3, 1, 0 }
  0x18   : > { %p2564_p5 = pneg %p3003_p3 }
  0x1a   : > { %p3012_p6 = pnand %p2564_p5, %p3414_p1 }
  0x1c   : > { %s2643_s13 = scalar_lea.hbm %s3428_s2, 2048  ;;  %p3028_p8 = pneg %p3012_p6 }
  0x1d   : > { %p2644_p7 = scmp.ne.s32.totalorder %s3428_s2, %s2643_s13  ;;  %p2650_p11 = scmp.lt.u32.totalorder %s2643_s13, %s3428_s2 }
  0x1f   : > { %p2646_p9 = pnand %p3028_p8, %p2644_p7 }
  0x21   : > { %p2647_p10 = pneg %p2646_p9 }
  0x23   : > { %p2652_p12 = pnand %p2650_p11, %p2647_p10 }
  0x25   : > { %2655 = shalt.err (!%p2652_p12)
}
  0x26   : > { %s2656_s28 = scalar_lea.vmem %s3001_s22, 2048  ;;  %p2664_p5 = scmp.lt.s32.totalorder %s3001_s22, %s3001_s22 }
  0x27   : > { %p2657_p13 = scmp.ne.s32.totalorder %s3001_s22, %s2656_s28  ;;  %p2665_p4 = scmp.lt.s32.totalorder %s2656_s28, %s2656_s28 }
  0x29   : > { %p2659_p0 = pnand %p2657_p13, %p3028_p8  ;;  %p2666_p7 = por %p2665_p4, %p2664_p5 }
  0x2b   : > { %p2660_p2 = pneg %p2659_p0 }
  0x2d   : > { %p2667_p9 = pnand %p2666_p7, %p2660_p2 }
  0x2f   : > { %2670 = shalt.err (!%p2667_p9)
}
  0x30   : > { %s3416_s30 = smov 128   ;;  %s3417_s12 = smov 8  }
  0x31   : > { %2567 = dma.hbm_to_vmem [thread:$0]  (!%p3012_p6), %s3428_s2, 2048, %s3001_s22, [#allocation9], %s3416_s30, %s3416_s30, %s3417_s12  }
  0x32   : > { %s3430_s4 = sld [smem:[#allocation25_spill]] }
  0x38   : > { %s2671_s25 = scalar_lea.hbm %s3430_s4, 3072 }
  0x39   : > { %p2672_p4 = scmp.ne.s32.totalorder %s3430_s4, %s2671_s25  ;;  %p2678_p12 = scmp.lt.u32.totalorder %s2671_s25, %s3430_s4 }
  0x3b   : > { %p2674_p10 = pnand %p2672_p4, %p3028_p8 }
  0x3d   : > { %p2675_p11 = pneg %p2674_p10 }
  0x3f   : > { %p2680_p13 = pnand %p2678_p12, %p2675_p11 }
  0x41   : > { %2683 = shalt.err (!%p2680_p13)
}
  0x42   : > { %s2684_s22 = scalar_lea.vmem %s3016_s26, 3072  ;;  %p2692_p7 = scmp.lt.s32.totalorder %s3016_s26, %s3016_s26 }
  0x43   : > { %p2685_p0 = scmp.ne.s32.totalorder %s3016_s26, %s2684_s22  ;;  %p2693_p9 = scmp.lt.s32.totalorder %s2684_s22, %s2684_s22 }
  0x45   : > { %p2687_p2 = pnand %p2685_p0, %p3028_p8  ;;  %p2694_p4 = por %p2693_p9, %p2692_p7 }
  0x47   : > { %p2688_p5 = pneg %p2687_p2 }
  0x49   : > { %p2695_p10 = pnand %p2694_p4, %p2688_p5 }
  0x4b   : > { %2698 = shalt.err (!%p2695_p10)
}
  0x4c   : > { %2570 = dma.hbm_to_vmem [thread:$0]  (!%p3012_p6), %s3430_s4, 3072, %s3016_s26, [#allocation12], %s3416_s30, %s3416_s30, %s3417_s12  }
  0x4d   : > { %s3431_s5 = sld [smem:[#allocation26_spill]] }
  0x53   : > { %s2699_s14 = scalar_lea.hbm %s3431_s5, 3072 }
  0x54   : > { %p2700_p11 = scmp.ne.s32.totalorder %s3431_s5, %s2699_s14  ;;  %p2706_p0 = scmp.lt.u32.totalorder %s2699_s14, %s3431_s5 }
  0x56   : > { %p2702_p12 = pnand %p2700_p11, %p3028_p8 }
  0x58   : > { %p2703_p13 = pneg %p2702_p12 }
  0x5a   : > { %p2708_p2 = pnand %p2706_p0, %p2703_p13 }
  0x5c   : > { %2711 = shalt.err (!%p2708_p2)
}
  0x5d   : > { %s2712_s26 = scalar_lea.vmem %s3018_s29, 3072  ;;  %p2720_p4 = scmp.lt.s32.totalorder %s3018_s29, %s3018_s29 }
  0x5e   : > { %p2713_p5 = scmp.ne.s32.totalorder %s3018_s29, %s2712_s26  ;;  %p2721_p10 = scmp.lt.s32.totalorder %s2712_s26, %s2712_s26 }
  0x60   : > { %p2715_p7 = pnand %p2713_p5, %p3028_p8  ;;  %p2722_p11 = por %p2721_p10, %p2720_p4 }
  0x62   : > { %p2716_p9 = pneg %p2715_p7 }
  0x64   : > { %p2723_p12 = pnand %p2722_p11, %p2716_p9 }
  0x66   : > { %2726 = shalt.err (!%p2723_p12)
}
  0x67   : > { %2573 = dma.hbm_to_vmem [thread:$0]  (!%p3012_p6), %s3431_s5, 3072, %s3018_s29, [#allocation12], %s3416_s30, %s3416_s30, %s3417_s12  }
  0x68   : > { %s2904_s10 = smov [#allocation14]   ;;  %s2727_s15 = scalar_lea.hbm %s3409_s8, 6144 }
  0x69   : > { %s364_s11 = sshll.u32 %s2904_s10, 4  ;;  %p2728_p13 = scmp.ne.s32.totalorder %s3409_s8, %s2727_s15  ;;  %s365_s11 = int_to_ptr.vmem [resolvable:$true] %s364_s11 }
  0x6a   : > { %p2734_p5 = scmp.lt.u32.totalorder %s2727_s15, %s3409_s8 }
  0x6b   : > { %p2730_p0 = pnand %p2728_p13, %p3028_p8 }
  0x6d   : > { %p2731_p2 = pneg %p2730_p0 }
  0x6f   : > { %p2736_p7 = pnand %p2734_p5, %p2731_p2 }
  0x71   : > { %2739 = shalt.err (!%p2736_p7)
}
  0x72   : > { %s2740_s29 = scalar_lea.vmem %s365_s11, 6144  ;;  %p2748_p11 = scmp.lt.s32.totalorder %s365_s11, %s365_s11 }
  0x73   : > { %p2741_p9 = scmp.ne.s32.totalorder %s365_s11, %s2740_s29  ;;  %p2749_p12 = scmp.lt.s32.totalorder %s2740_s29, %s2740_s29 }
  0x75   : > { %p2743_p4 = pnand %p2741_p9, %p3028_p8  ;;  %p2750_p1 = por %p2749_p12, %p2748_p11 }
  0x77   : > { %p2744_p10 = pneg %p2743_p4 }
  0x79   : > { %p2751_p3 = pnand %p2750_p1, %p2744_p10 }
  0x7b   : > { %2754 = shalt.err (!%p2751_p3)
}
  0x7c   : > { %2576 = dma.hbm_to_vmem [thread:$0]  (!%p3012_p6), %s3409_s8, 6144, %s365_s11, [#allocation15], %s3416_s30, %s3416_s30, %s3417_s12  }
  0x7d   : > { %s1885_s27 = sadd.s32 4294967294, %s2897_s20   ;;  %s3127_s16 = sadd.s32 1, %s2897_s20  }
  0x7e   : > { %s36_s10 = ssub.s32 %s2897_s20, %s3127_s16  ;;  %s39_s13 = sadd.s32 1, %s2893_s19 }
  0x7f   : > { %p37_p1 = scmp.eq.s32.totalorder %s36_s10, 0  ;;  %p46_p3 = scmp.ne.s32.totalorder %s2893_s19, %s2889_s18 }
  0x80   : > { %p47_p8 = scmp.eq.s32.totalorder %s2897_s20, 0  ;;  %p52_p13 = scmp.ne.s32.totalorder %s2889_s18, %s2885_s17 }
  0x81   : > { %s3138_s14 = scalar_select %p37_p1, %s2893_s19, %s39_s13  }
  0x82   : > { %p3140_p0 = por %p47_p8, %p46_p3  ;;  %p3433_p2 = scmp.eq.s32.totalorder %s2996_s23, 0 }
  0x83   : > { %p291_p5 = scmp.eq.s32.totalorder %s2996_s23, 1  ;;  %p297_p7 = scmp.eq.s32.totalorder %s1885_s27, 1 }
  0x84   : > { %p3146_p6 = por %p3433_p2, %p52_p13  ;;  %p2592_p9 = scmp.lt.s32.totalorder %s2897_s20, 2 }
  0x85   : > { %s3153_s21 = sand.u32 1, %s2893_s19   ;;  %p3155_p4 = por %p291_p5, %p46_p3 }
  0x86   : > { %p3159_p10 = por %p297_p7, %p52_p13  ;;  %s1892_s26 = sshll.u32 %s3153_s21, 3 }
  0x87   : > { %s3435_s25 = scalar_select %p3155_p4, 1, 0 }
  0x88   : > { %s3436_s28 = scalar_select %p3159_p10, 1, 0 }
  0x89   : > { %s1893_s29 = sshll.u32 %s2897_s20, 7  ;;  %s3437_s0 = sld [smem:[#allocation23_spill]] }
  0x8a   : > { %s388_s10 = scalar_lea.vmem [#allocation5], %s1892_s26  ;;  %p3174_p11 = pnand %p2592_p9, %p3140_p0 }
  0x8b   : > { %s395_s13 = sshll.u32 %s388_s10, 4  ;;  %s1894_s12 = sshll.u32 %s3153_s21, 4  ;;  %s3170_s13 = int_to_ptr.vmem [resolvable:$true] %s395_s13 }
  0x8c   : > { %s385_s22 = scalar_lea.sflag [#allocation6], %s3153_s21  ;;  %p2757_p1 = pneg %p3174_p11 }
  0x8f   : > { %s3168_s27 = scalar_lea.hbm %s3437_s0, %s1893_s29  ;;  %s2760_s15 = scalar_lea.hbm %s3437_s0, 256 }
  0x90   : > { %s2755_s29 = scalar_lea.hbm %s3168_s27, 128  ;;  %p2761_p13 = scmp.lt.u32.totalorder %s3168_s27, %s3437_s0 }
  0x91   : > { %p2756_p12 = scmp.ne.s32.totalorder %s3168_s27, %s2755_s29  ;;  %p2762_p0 = scmp.lt.u32.totalorder %s2760_s15, %s2755_s29 }
  0x92   : > { %p2764_p5 = scmp.lt.u32.totalorder %s2755_s29, %s3168_s27 }
  0x93   : > { %p2758_p3 = pnand %p2757_p1, %p2756_p12  ;;  %p2763_p2 = por %p2762_p0, %p2761_p13 }
  0x95   : > { %p2759_p8 = pneg %p2758_p3  ;;  %p2765_p7 = por %p2764_p5, %p2763_p2 }
  0x97   : > { %p2766_p9 = pnand %p2765_p7, %p2759_p8 }
  0x99   : > { %2769 = shalt.err (!%p2766_p9)
}
  0x9a   : > { %s2770_s2 = scalar_lea.vmem %s3170_s13, 128  ;;  %s2905_s26 = smov [#allocation5]  }
  0x9b   : > { %p2771_p12 = scmp.ne.s32.totalorder %s3170_s13, %s2770_s2  ;;  %s2775_s9 = sshll.u32 %s2905_s26, 4  ;;  %s2776_s9 = int_to_ptr.vmem [resolvable:$false] %s2775_s9 }
  0x9c   : > { %s2777_s4 = scalar_lea.vmem %s2776_s9, 256  ;;  %p2778_p4 = scmp.lt.s32.totalorder %s3170_s13, %s2776_s9 }
  0x9d   : > { %p2773_p3 = pnand %p2771_p12, %p2757_p1  ;;  %p2779_p13 = scmp.lt.s32.totalorder %s2777_s4, %s2770_s2 }
  0x9f   : > { %p2774_p10 = pneg %p2773_p3  ;;  %p2780_p0 = por %p2779_p13, %p2778_p4 }
  0xa1   : > { %p2781_p2 = pnand %p2780_p0, %p2774_p10 }
  0xa3   : > { %2784 = shalt.err (!%p2781_p2)
}
  0xa4   : > { %2580 = dma.hbm_to_vmem [thread:$0]  (!%p3174_p11), %s3168_s27, 128, %s3170_s13, %s385_s22  }
  0xa5   : > { %s406_s29 = scalar_lea.vmem [#allocation8], %s1894_s12  ;;  %s1929_s10 = sshll.u32 %s2897_s20, 8 }
  0xa6   : > { %s413_s15 = sshll.u32 %s406_s29, 4  ;;  %s3214_s9 = scalar_lea.hbm %s3402_s1, %s1929_s10  ;;  %s3208_s15 = int_to_ptr.vmem [resolvable:$true] %s413_s15 }
  0xa7   : > { %s3439_s4 = sand.u32 1, %s2897_s20   ;;  %s2785_s5 = scalar_lea.hbm %s3214_s9, 256 }
  0xa8   : > { %s3218_s0 = scalar_lea.sflag [#allocation9], %s3439_s4  ;;  %p2786_p4 = scmp.ne.s32.totalorder %s3214_s9, %s2785_s5 }
  0xa9   : > { %s2790_s27 = scalar_lea.hbm %s3402_s1, 512  ;;  %p2791_p5 = scmp.lt.u32.totalorder %s3214_s9, %s3402_s1 }
  0xaa   : > { %p2788_p10 = pnand %p2786_p4, %p2757_p1  ;;  %p2792_p7 = scmp.lt.u32.totalorder %s2790_s27, %s2785_s5 }
  0xab   : > { %p2794_p12 = scmp.lt.u32.totalorder %s2785_s5, %s3214_s9 }
  0xac   : > { %p2789_p8 = pneg %p2788_p10  ;;  %p2793_p9 = por %p2792_p7, %p2791_p5 }
  0xae   : > { %p2795_p3 = por %p2794_p12, %p2793_p9 }
  0xb0   : > { %p2796_p13 = pnand %p2795_p3, %p2789_p8 }
  0xb2   : > { %2799 = shalt.err (!%p2796_p13)
}
  0xb3   : > { %s2800_s29 = scalar_lea.vmem %s3208_s15, 256  ;;  %s2906_s10 = smov [#allocation8]  }
  0xb4   : > { %p2801_p0 = scmp.ne.s32.totalorder %s3208_s15, %s2800_s29  ;;  %s2805_s26 = sshll.u32 %s2906_s10, 4  ;;  %s2806_s26 = int_to_ptr.vmem [resolvable:$false] %s2805_s26 }
  0xb5   : > { %s2807_s2 = scalar_lea.vmem %s2806_s26, 512  ;;  %p2808_p10 = scmp.lt.s32.totalorder %s3208_s15, %s2806_s26 }
  0xb6   : > { %p2803_p2 = pnand %p2801_p0, %p2757_p1  ;;  %p2809_p5 = scmp.lt.s32.totalorder %s2807_s2, %s2800_s29 }
  0xb8   : > { %p2804_p4 = pneg %p2803_p2  ;;  %p2810_p7 = por %p2809_p5, %p2808_p10 }
  0xba   : > { %p2811_p9 = pnand %p2810_p7, %p2804_p4 }
  0xbc   : > { %2814 = shalt.err (!%p2811_p9)
}
  0xbd   : > { %s3440_s5 = smov 8   ;;  %s3441_s4 = smov 128  }
  0xbe   : > { %2583 = dma.hbm_to_vmem [thread:$0]  (!%p3174_p11), %s3214_s9, 256, %s3208_s15, %s3218_s0, %s3441_s4, %s3441_s4, %s3440_s5  }
  0xbf   : > { %p3442_p1 = scmp.ne.s32.totalorder %s3426_s24, 0 }
  0xc0   : > { %s3250_s12 = sand.u32 (!%p3442_p1), 1, %s2889_s18  }
  0xc1   : > { %425 = sbr.rel (%p3442_p1) target bundleno = 1008 (0x3f0), region = 64  ;;  %s1898_s21 = sshll.u32 (!%p3442_p1), %s3250_s12, 3 }
  0xc2   : > { %s428_s27 = scalar_lea.sflag (!%p3442_p1), [#allocation6], %s3250_s12  ;;  %s3254_s13 = scalar_lea.vmem (!%p3442_p1), [#allocation5], %s1898_s21 }
  0xc8   : > { %2860 = dma.done.wait (%p3146_p6), %s428_s27, 128  }
  0xc9   : > { %2862 = vsyncadd (%p3146_p6), %s428_s27, 4294967168  ;;  %s436_s0 = sand.u32 1, %s2996_s23   ;;  %s1899_s24 = sshll.u32 %s3250_s12, 4 }
  0xca   : > { %s437_s30 = scalar_lea.sflag [#allocation9], %s436_s0  ;;  %s3264_s15 = scalar_lea.vmem [#allocation8], %s1899_s24 }
  0xcb   : > { %2864 = dma.done.wait (%p3146_p6), %s437_s30, 256  }
  0xcc   : > { %2866 = vsyncadd (%p3146_p6), %s437_s30, 4294967040  ;;  %p3443_p11 = scmp.eq.s32.totalorder %s2996_s23, 0 }
  0xce   : > { %2868 = dma.done.wait (%p3443_p11), [#allocation9], 2048   ;;  %p3444_p8 = pmov %p3443_p11 }
  0xd0   : > { %2870 = vsyncadd (%p3444_p8), [#allocation9], 4294965248  ;;  %p3445_p12 = pmov %p3444_p8 }
  0xd1   : > { %p3446_p3 = pmov %p3444_p8 }
  0xd2   : > { %2872 = dma.done.wait (%p3445_p12), [#allocation12], 6144  }
  0xd3   : > { %2874 = vsyncadd (%p3446_p3), [#allocation12], 4294961152  ;;  %p3447_p13 = pmov %p3446_p3 }
  0xd4   : > { %p3448_p0 = pmov %p3446_p3 }
  0xd5   : > { %2876 = dma.done.wait (%p3447_p13), [#allocation15], 6144  }
  0xd6   : > { %2878 = vsyncadd (%p3448_p0), [#allocation15], 4294961152  ;;  %v2907_v0 = vmov 0.0|0.0   ;;  %vm2908_vm0 = vmmov 0   ;;  %v2909_v1 = vmov 0.0   ;;  %v502_v2 = vld [vmem:[#allocation10] sm:$0xff] }
  0xd7   : > { %2320 = vmatprep.subr.bf16.mxu0 %v2907_v0  ;;  %2332 = vmatprep.subr.bf16.mxu1 %v2907_v0  ;;  %v503_v3 = vld [vmem:[#allocation10 + $0x8] sm:$0xff]  ;;  %v658_v4 = vld [vmem:[#allocation10 + $0x40] sm:$0xff]  ;;  %v504_v7 = vld [vmem:[#allocation10 + $0x10] sm:$0xff]  ;;  %vm516_vm1 = vcmask 523264   ;;  %vm1226_vm2 = vcmask 1046528   ;;  %vm648_vm3 = vcmask 516096  }
  0xd8   : > { %2079 = vmatprep.mubr.msk.f32.mxu0 %vm2908_vm0, %v2909_v1  ;;  %2098 = vmatprep.mubr.msk.f32.mxu1 %vm2908_vm0, %v2909_v1  ;;  %v2321_v5 = vpack.c.bf16 %v503_v3, %v502_v2  ;;  %v659_v6 = vld [vmem:[#allocation10 + $0x48] sm:$0xff]  ;;  %v505_v8 = vld [vmem:[#allocation10 + $0x18] sm:$0xff]  ;;  %v660_v10 = vld [vmem:[#allocation10 + $0x50] sm:$0xff]  ;;  %s3449_s4 = sld [smem:[#allocation27_spill]]  ;;  %s499_s0 = scalar_lea.vmem [#allocation16], %s1899_s24 }
  0xd9   : > { %v2333_v9 = vpack.c.bf16 %v659_v6, %v658_v4  ;;  %v661_v11 = vld [vmem:[#allocation10 + $0x58] sm:$0xff]  ;;  %v2324_v12 = vpack.c.bf16 %v505_v8, %v504_v7  ;;  %v506_v14 = vld [vmem:[#allocation10 + $0x20] sm:$0xff]  ;;  %v507_v15 = vld [vmem:[#allocation10 + $0x28] sm:$0xff]  ;;  %s1930_s30 = sshll.u32 %s2996_s23, 8  ;;  %s3451_s22 = sld [smem:[#allocation29_spill]] }
  0xda   : > { %2322 = vmatpush3.bf16.msra.mxu0 %v2321_v5  ;;  %v2336_v13 = vpack.c.bf16 %v661_v11, %v660_v10  ;;  %v662_v16 = vld [vmem:[#allocation10 + $0x60] sm:$0xff]  ;;  %v663_v17 = vld [vmem:[#allocation10 + $0x68] sm:$0xff]  ;;  %v2327_v18 = vpack.c.bf16 %v507_v15, %v506_v14  ;;  %v508_v20 = vld [vmem:[#allocation10 + $0x30] sm:$0xff]  ;;  %s1738_s10 = scalar_lea.sflag [#allocation7], %s3250_s12  ;;  %p3452_p2 = scmp.ne.s32.totalorder %s3435_s25, 0 }
  0xdb   : > { %2334 = vmatpush3.bf16.msra.mxu1 %v2333_v9  ;;  %2323 = vmatprep.subr.bf16.mxu0 %v2907_v0  ;;  %v2339_v19 = vpack.c.bf16 %v663_v17, %v662_v16  ;;  %v509_v21 = vld [vmem:[#allocation10 + $0x38] sm:$0xff]  ;;  %v664_v22 = vld [vmem:[#allocation10 + $0x70] sm:$0xff]  ;;  %v822_v24 = vld [vmem:[#allocation13 + $0x40] sm:$0xff]  ;;  %s2912_s23 = smov [#allocation16]  }
  0xdc   : > { %2335 = vmatprep.subr.bf16.mxu1 %v2907_v0  ;;  %v665_v23 = vld [vmem:[#allocation10 + $0x78] sm:$0xff]  ;;  %v823_v25 = vld [vmem:[#allocation13 + $0x48] sm:$0xff]  ;;  %v1044_v26 = vld [vmem:[#allocation13] sm:$0xff]  ;;  %v2330_v28 = vpack.c.bf16 %v509_v21, %v508_v20  ;;  %v595_v21 = vlaneseq  ;;  %s2819_s24 = sshll.u32 %s2912_s23, 4  ;;  %s2820_s24 = int_to_ptr.vmem [resolvable:$false] %s2819_s24 }
  0xdd   : > { %v1045_v27 = vld [vmem:[#allocation13 + $0x8] sm:$0xff]  ;;  %v2342_v29 = vpack.c.bf16 %v665_v23, %v664_v22  ;;  %v2344_v30 = vpack.c.bf16 %v823_v25, %v822_v24  ;;  %v824_v32 = vld [vmem:[#allocation13 + $0x50] sm:$0xff]  ;;  %v825_v33 = vld [vmem:[#allocation13 + $0x58] sm:$0xff]  ;;  %s2821_s2 = scalar_lea.vmem %s2820_s24, 512 }
  0xde   : > { %2325 = vmatpush3.bf16.msra.mxu0 %v2324_v12  ;;  %v2376_v31 = vpack.c.bf16 %v1045_v27, %v1044_v26  ;;  %v1046_v34 = vld [vmem:[#allocation13 + $0x10] sm:$0xff]  ;;  %v1047_v35 = vld [vmem:[#allocation13 + $0x18] sm:$0xff]  ;;  %v2348_v37 = vpack.c.bf16 %v825_v33, %v824_v32  ;;  %v826_v39 = vld [vmem:[#allocation13 + $0x60] sm:$0xff]  ;;  %v596_v23 = vshrl.u32 %v595_v21, 7 }
  0xdf   : > { %2337 = vmatpush3.bf16.msra.mxu1 %v2336_v13  ;;  %2326 = vmatprep.subr.bf16.mxu0 %v2907_v0  ;;  %v500_v36 = vld [vmem:[%s3254_s13] sm:$0xff]  ;;  %v2380_v38 = vpack.c.bf16 %v1047_v35, %v1046_v34  ;;  %v827_v40 = vld [vmem:[#allocation13 + $0x68] sm:$0xff]  ;;  %v1048_v42 = vld [vmem:[#allocation13 + $0x20] sm:$0xff]  ;;  %s3450_s13 = sld [smem:[#allocation28_spill]]  ;;  %s3355_s29 = scalar_lea.hbm %s3451_s22, %s1930_s30 }
  0xe0   : > { %2338 = vmatprep.subr.bf16.mxu1 %v2907_v0  ;;  %v2352_v41 = vpack.c.bf16 %v827_v40, %v826_v39  ;;  %v1049_v43 = vld [vmem:[#allocation13 + $0x28] sm:$0xff]  ;;  %v828_v45 = vld [vmem:[#allocation13 + $0x70] sm:$0xff]  ;;  %v829_v46 = vld [vmem:[#allocation13 + $0x78] sm:$0xff] }
  0xe1   : > { %v2384_v44 = vpack.c.bf16 %v1049_v43, %v1048_v42  ;;  %v2356_v47 = vpack.c.bf16 %v829_v46, %v828_v45  ;;  %v1050_v48 = vld [vmem:[#allocation13 + $0x30] sm:$0xff]  ;;  %v1051_v49 = vld [vmem:[#allocation13 + $0x38] sm:$0xff]  ;;  %v813_v51 = vld [vmem:[#allocation11 + $0x40] sm:$0xff] }
  0xe2   : > { %2328 = vmatpush3.bf16.msra.mxu0 %v2327_v18  ;;  %v2388_v50 = vpack.c.bf16 %v1051_v49, %v1050_v48  ;;  %v814_v52 = vld [vmem:[#allocation11 + $0x48] sm:$0xff]  ;;  %v1036_v54 = vld [vmem:[#allocation11] sm:$0xff]  ;;  %v815_v59 = vld [vmem:[#allocation11 + $0x50] sm:$0xff] }
  0xe3   : > { %2340 = vmatpush3.bf16.msra.mxu1 %v2339_v19  ;;  %2329 = vmatprep.subr.bf16.mxu0 %v2907_v0  ;;  %v2360_v53 = vpack.c.bf16 %v814_v52, %v813_v51  ;;  %v1037_v55 = vld [vmem:[#allocation11 + $0x8] sm:$0xff]  ;;  %v810_v56 = vld [vmem:[%s3264_s15] sm:$0xff]  ;;  %v816_v60 = vld [vmem:[#allocation11 + $0x58] sm:$0xff]  ;;  %v2910_v19 = vmov 1966171168  }
  0xe4   : > { %2341 = vmatprep.subr.bf16.mxu1 %v2907_v0  ;;  %v2392_v57 = vpack.c.bf16 %v1037_v55, %v1036_v54  ;;  %v3288_v58 = vld [vmem:[%s3264_s15 + $0x8] sm:$0xff]  ;;  %v2364_v61 = vpack.c.bf16 %v816_v60, %v815_v59  ;;  %v1038_v62 = vld [vmem:[#allocation11 + $0x10] sm:$0xff]  ;;  %v817_v1 = vld [vmem:[#allocation11 + $0x60] sm:$0xff]  ;;  %v1227_v16 = vrot.slane %v810_v56, 1  ;;  %v593_v20 = vunpack.c.l.s4 %v2910_v19  ;;  %s1751_s15 = sshll.u32 %s499_s0, 4  ;;  %s3357_s15 = int_to_ptr.vmem [resolvable:$true] %s1751_s15 }
  0xe5   : > { %v1039_v63 = vld [vmem:[#allocation11 + $0x18] sm:$0xff]  ;;  %v818_v2 = vld [vmem:[#allocation11 + $0x68] sm:$0xff]  ;;  %v1040_v3 = vld [vmem:[#allocation11 + $0x20] sm:$0xff]  ;;  %v1228_v17 = vrot.slane %v3288_v58, 1  ;;  %s2815_s26 = scalar_lea.vmem %s3357_s15, 256  ;;  %p2822_p5 = scmp.lt.s32.totalorder %s3357_s15, %s2820_s24 }
  0xe6   : > { %2331 = vmatpush3.bf16.msra.mxu0 %v2330_v28  ;;  %v2396_v0 = vpack.c.bf16 %v1039_v63, %v1038_v62  ;;  %v2368_v4 = vpack.c.bf16 %v818_v2, %v817_v1  ;;  %v1041_v5 = vld [vmem:[#allocation11 + $0x28] sm:$0xff]  ;;  %v819_v6 = vld [vmem:[#allocation11 + $0x70] sm:$0xff]  ;;  %v820_v7 = vld [vmem:[#allocation11 + $0x78] sm:$0xff]  ;;  %v594_v22 = vunpack.c.0.s8 %v593_v20  ;;  %p2816_p6 = scmp.ne.s32.totalorder %s3357_s15, %s2815_s26  ;;  %p2823_p7 = scmp.lt.s32.totalorder %s2821_s2, %s2815_s26 }
  0xe7   : > { %2343 = vmatpush3.bf16.msra.mxu1 %v2342_v29  ;;  %2345 = vmatprep.subr.bf16.mxu0 %v2344_v30  ;;  %v2400_v8 = vpack.c.bf16 %v1041_v5, %v1040_v3  ;;  %v1042_v9 = vld [vmem:[#allocation11 + $0x30] sm:$0xff]  ;;  %v1043_v10 = vld [vmem:[#allocation11 + $0x38] sm:$0xff]  ;;  %v2372_v11 = vpack.c.bf16 %v820_v7, %v819_v6  ;;  %v1218_v13 = vld [vmem:[#allocation13 + $0x80] sm:$0xff]  ;;  %v3302_v18 = vsel %vm1226_vm2, %v1227_v16, %v1228_v17 }
  0xe8   : > { %2377 = vmatprep.subr.bf16.mxu1 %v2376_v31  ;;  %v2404_v12 = vpack.c.bf16 %v1043_v10, %v1042_v9  ;;  %v1219_v14 = vld [vmem:[#allocation13 + $0x88] sm:$0xff]  ;;  %v1905_v24 = vld [vmem:[%s3404_s3] ss:$0 sm:$0xff]  ;;  %v597_v25 = vsub.s32 %v594_v22, %v596_v23  ;;  %p2817_p4 = pnand %p2816_p6, %p3452_p2  ;;  %p2824_p9 = por %p2823_p7, %p2822_p5 }
  0xe9   : > { %2080 = vmatmul.mubr.msk.f32.vlgmr.msra.gmra.mrb[0].mxu0 %vm516_vm1, %v500_v36  ;;  %v3295_v15 = vpack.c.bf16 %v1219_v14, %v1218_v13  ;;  %v1220_v13 = vld [vmem:[#allocation13 + $0x90] sm:$0xff]  ;;  %v1221_v14 = vld [vmem:[#allocation13 + $0x98] sm:$0xff] }
  0xea   : > { %2099 = vmatmul.mubr.msk.f32.vlgmr.msra.gmra.mrb[0].mxu1 %vm516_vm1, %v500_v36  ;;  %2347 = vmatpush3.bf16.msra.mxu0 %v2344_v30  ;;  %v2412_v22 = vpack.c.bf16 %v1221_v14, %v1220_v13  ;;  %v1430_v13 = vld [vmem:[#allocation14 + $0xe0] sm:$0xff]  ;;  %v1431_v14 = vld [vmem:[#allocation14 + $0xe8] sm:$0xff]  ;;  %p2818_p10 = pneg %p2817_p4 }
  0xeb   : > { %2379 = vmatpush3.bf16.msra.mxu1 %v2376_v31  ;;  %2349 = vmatprep.subr.bf16.mxu0 %v2348_v37 }
  0xec   : > { %2381 = vmatprep.subr.bf16.mxu1 %v2380_v38  ;;  %2117 = vmatprep.mubr.msk.f32.mxu0 %vm516_vm1, %v810_v56  ;;  %p2825_p1 = pnand %p2824_p9, %p2818_p10 }
  0xed   : > { %2155 = vmatprep.mubr.msk.f32.mxu1 %vm516_vm1, %v810_v56  ;;  %v2911_v56 = vmov 1983009808  }
  0xee   : > { %2351 = vmatpush3.bf16.msra.mxu0 %v2348_v37 }
  0xef   : > { %2383 = vmatpush3.bf16.msra.mxu1 %v2380_v38  ;;  %2353 = vmatprep.subr.bf16.mxu0 %v2352_v41 }
  0xf0   : > { %2385 = vmatprep.subr.bf16.mxu1 %v2384_v44 }
  0xf2   : > { %2355 = vmatpush3.bf16.msra.mxu0 %v2352_v41 }
  0xf3   : > { %2387 = vmatpush3.bf16.msra.mxu1 %v2384_v44  ;;  %2357 = vmatprep.subr.bf16.mxu0 %v2356_v47 }
  0xf4   : > { %2389 = vmatprep.subr.bf16.mxu1 %v2388_v50 }
  0xf6   : > { %2359 = vmatpush3.bf16.msra.mxu0 %v2356_v47 }
  0xf7   : > { %2391 = vmatpush3.bf16.msra.mxu1 %v2388_v50  ;;  %2361 = vmatprep.subr.bf16.mxu0 %v2360_v53 }
  0xf8   : > { %2393 = vmatprep.subr.bf16.mxu1 %v2392_v57 }
  0xf9   : > { %2118 = vmatmul.mubr.msk.f32.vlgmr.msra.gmra.mrb[2].mxu0 %vm516_vm1, %v3288_v58 }
  0xfa   : > { %2363 = vmatpush3.bf16.msra.mxu0 %v2360_v53  ;;  %2156 = vmatmul.mubr.msk.f32.vlgmr.msra.gmra.mrb[2].mxu1 %vm516_vm1, %v3288_v58  ;;  %v1418_v58 = vld [vmem:[#allocation14 + $0x80] sm:$0xff] }
  0xfb   : > { %2395 = vmatpush3.bf16.msra.mxu1 %v2392_v57  ;;  %2365 = vmatprep.subr.bf16.mxu0 %v2364_v61  ;;  %v922_v57 = vunpack.c.l.s4 %v2911_v56 }
  0xfc   : > { %2397 = vmatprep.subr.bf16.mxu1 %v2396_v0 }
  0xfe   : > { %2367 = vmatpush3.bf16.msra.mxu0 %v2364_v61  ;;  %v923_v61 = vunpack.c.0.s8 %v922_v57 }
  0xff   : > { %2369 = vmatprep.subr.bf16.mxu0 %v2368_v4  ;;  %2399 = vmatpush3.bf16.msra.mxu1 %v2396_v0 }
 0x100   : > { %2401 = vmatprep.subr.bf16.mxu1 %v2400_v8  ;;  %v926_v2 = vsub.s32 %v923_v61, %v596_v23  ;;  %v1222_v23 = vld [vmem:[#allocation13 + $0xa0] sm:$0xff]  ;;  %v1519_v61 = vld [vmem:[#allocation14 + $0x30] sm:$0xff] }
 0x102   : > { %2371 = vmatpush3.bf16.msra.mxu0 %v2368_v4 }
 0x103   : > { %2373 = vmatprep.subr.bf16.mxu0 %v2372_v11  ;;  %2403 = vmatpush3.bf16.msra.mxu1 %v2400_v8 }
 0x104   : > { %2405 = vmatprep.subr.bf16.mxu1 %v2404_v12 }
 0x106   : > { %2375 = vmatpush3.bf16.msra.mxu0 %v2372_v11 }
 0x107   : > { %2407 = vmatpush3.bf16.msra.mxu1 %v2404_v12  ;;  %2409 = vmatprep.subr.bf16.mxu0 %v3295_v15 }
 0x1bc   : > { %v586_v26 = vpop.f32.mrb[0].mxu0 }
 0x1bd   : > { %v587_v27 = vadd.f32 %v1905_v24, %v586_v26  ;;  %v732_v28 = vpop.f32.mrb[0].mxu1  ;;  %v2081_v29 = vpop.f32.mrb[1].mxu0  ;;  %v1224_v26 = vld [vmem:[#allocation13 + $0xb0] sm:$0xff] }
 0x1be   : > { %v733_v30 = vadd.f32 %v1905_v24, %v732_v28  ;;  %v2100_v31 = vpop.f32.mrb[1].mxu1  ;;  %v1223_v24 = vld [vmem:[#allocation13 + $0xa8] sm:$0xff]  ;;  %v1209_v29 = vld [vmem:[#allocation11 + $0x80] sm:$0xff] }
 0x1bf   : > { %v591_v32 = vcombine.high %v587_v27, %v587_v27  ;;  %v598_v33 = vrot.slane %v587_v27, %v597_v25  ;;  %v1225_v27 = vld [vmem:[#allocation13 + $0xb8] sm:$0xff] }
 0x1c0   : > { %v737_v34 = vcombine.high %v733_v30, %v733_v30  ;;  %v744_v35 = vrot.slane %v733_v30, %v597_v25  ;;  %v2420_v28 = vpack.c.bf16 %v1225_v27, %v1224_v26  ;;  %v1210_v30 = vld [vmem:[#allocation11 + $0x88] sm:$0xff]  ;;  %v1528_v26 = vld [vmem:[#allocation14 + $0x78] sm:$0xff] }
 0x1c1   : > { %v605_v36 = vrot.slane %v591_v32, %v597_v25  ;;  %v606_v37 = vcombine.high %v598_v33, %v598_v33  ;;  %v614_v38 = vrot.slane %v598_v33, %v597_v25  ;;  %v2424_v31 = vpack.c.bf16 %v1210_v30, %v1209_v29  ;;  %v1211_v32 = vld [vmem:[#allocation11 + $0x90] sm:$0xff]  ;;  %v1212_v33 = vld [vmem:[#allocation11 + $0x98] sm:$0xff]  ;;  %v1612_v29 = vld [vmem:[#allocation14 + $0x108] sm:$0xff] }
 0x1c2   : > { %v751_v39 = vrot.slane %v737_v34, %v597_v25  ;;  %v752_v40 = vcombine.high %v744_v35, %v744_v35  ;;  %v760_v41 = vrot.slane %v744_v35, %v597_v25  ;;  %v2428_v35 = vpack.c.bf16 %v1212_v33, %v1211_v32 }
 0x1c3   : > { %v607_v42 = vcombine.high %v605_v36, %v605_v36  ;;  %v621_v43 = vrot.slane %v605_v36, %v597_v25  ;;  %v628_v44 = vrot.slane %v606_v37, %v597_v25  ;;  %v636_v45 = vcombine.high %v614_v38, %v614_v38  ;;  %649 = vst.msk [vmem:[#allocation2] sm:$0x1] %vm648_vm3, %v614_v38  ;;  %v1214_v36 = vld [vmem:[#allocation11 + $0xa8] sm:$0xff] }
 0x1c4   : > { %v753_v46 = vcombine.high %v751_v39, %v751_v39  ;;  %v767_v47 = vrot.slane %v751_v39, %v597_v25  ;;  %v774_v48 = vrot.slane %v752_v40, %v597_v25  ;;  %v782_v49 = vcombine.high %v760_v41, %v760_v41  ;;  %794 = vst.msk [vmem:[#allocation2 + $0x1] sm:$0x1] %vm648_vm3, %v760_v41  ;;  %v1215_v39 = vld [vmem:[#allocation11 + $0xb0] sm:$0xff]  ;;  %v1216_v40 = vld [vmem:[#allocation11 + $0xb8] sm:$0xff] }
 0x1c5   : > { %v635_v50 = vrot.slane %v607_v42, %v597_v25  ;;  %v637_v51 = vcombine.high %v621_v43, %v621_v43  ;;  %v638_v52 = vcombine.high %v628_v44, %v628_v44  ;;  %650 = vst.msk [vmem:[#allocation2 + $0x2] sm:$0x1] %vm648_vm3, %v628_v44  ;;  %651 = vst.msk [vmem:[#allocation2 + $0x4] sm:$0x1] %vm648_vm3, %v636_v45  ;;  %v1419_v42 = vld [vmem:[#allocation14 + $0x88] sm:$0xff]  ;;  %v1420_v45 = vld [vmem:[#allocation14 + $0x90] sm:$0xff] }
 0x1c6   : > { %653 = vst.msk [vmem:[#allocation2 + $0x8] sm:$0x1] %vm648_vm3, %v621_v43  ;;  %v781_v53 = vrot.slane %v753_v46, %v597_v25  ;;  %v783_v54 = vcombine.high %v767_v47, %v767_v47  ;;  %v784_v55 = vcombine.high %v774_v48, %v774_v48  ;;  %795 = vst.msk [vmem:[#allocation2 + $0x3] sm:$0x1] %vm648_vm3, %v774_v48  ;;  %v1514_v44 = vld [vmem:[#allocation14 + $0x8] sm:$0xff]  ;;  %v1421_v46 = vld [vmem:[#allocation14 + $0x98] sm:$0xff] }
 0x1c7   : > { %796 = vst.msk [vmem:[#allocation2 + $0x5] sm:$0x1] %vm648_vm3, %v782_v49  ;;  %798 = vst.msk [vmem:[#allocation2 + $0x9] sm:$0x1] %vm648_vm3, %v767_v47  ;;  %v639_v59 = vcombine.high %v635_v50, %v635_v50  ;;  %v2416_v25 = vpack.c.bf16 %v1223_v24, %v1222_v23  ;;  %v2436_v41 = vpack.c.bf16 %v1216_v40, %v1215_v39  ;;  %v1515_v49 = vld [vmem:[#allocation14 + $0x10] sm:$0xff] }
 0x1c8   : > { %652 = vst.msk [vmem:[#allocation2 + $0x6] sm:$0x1] %vm648_vm3, %v638_v52  ;;  %654 = vst.msk [vmem:[#allocation2 + $0xa] sm:$0x1] %vm648_vm3, %v635_v50  ;;  %v785_v60 = vcombine.high %v781_v53, %v781_v53  ;;  %v2440_v43 = vpack.c.bf16 %v1419_v42, %v1418_v58  ;;  %v2444_v48 = vpack.c.bf16 %v1421_v46, %v1420_v45  ;;  %v1516_v50 = vld [vmem:[#allocation14 + $0x18] sm:$0xff] }
 0x1c9   : > { %655 = vst.msk [vmem:[#allocation2 + $0xc] sm:$0x1] %vm648_vm3, %v637_v51  ;;  %797 = vst.msk [vmem:[#allocation2 + $0x7] sm:$0x1] %vm648_vm3, %v784_v55  ;;  %v1422_v51 = vld [vmem:[#allocation14 + $0xa0] sm:$0xff]  ;;  %v2476_v52 = vpack.c.bf16 %v1516_v50, %v1515_v49  ;;  %v1518_v55 = vld [vmem:[#allocation14 + $0x28] sm:$0xff] }
 0x1ca   : > { %799 = vst.msk [vmem:[#allocation2 + $0xb] sm:$0x1] %vm648_vm3, %v781_v53  ;;  %800 = vst.msk [vmem:[#allocation2 + $0xd] sm:$0x1] %vm648_vm3, %v783_v54  ;;  %2441 = vmatprep.subr.bf16.mxu1 %v2440_v43  ;;  %v1423_v53 = vld [vmem:[#allocation14 + $0xa8] sm:$0xff]  ;;  %v1517_v54 = vld [vmem:[#allocation14 + $0x20] sm:$0xff] }
 0x1cb   : > { %656 = vst.msk [vmem:[#allocation2 + $0xe] sm:$0x1] %vm648_vm3, %v639_v59  ;;  %801 = vst.msk [vmem:[#allocation2 + $0xf] sm:$0x1] %vm648_vm3, %v785_v60  ;;  %v802_v62 = vld [vmem:[#allocation2] sm:$0x3]  ;;  %v2448_v56 = vpack.c.bf16 %v1423_v53, %v1422_v51  ;;  %v2480_v57 = vpack.c.bf16 %v1518_v55, %v1517_v54 }
 0x1cc   : > { %v1424_v59 = vld [vmem:[#allocation14 + $0xb0] sm:$0xff]  ;;  %v1425_v60 = vld [vmem:[#allocation14 + $0xb8] sm:$0xff]  ;;  %v1920_v58 = vld [vmem:[%s3407_s6] ss:$0 sm:$0xff] }
 0x1cd   : > { %v803_v63 = vld [vmem:[#allocation2 + $0x2] sm:$0x3]  ;;  %v1614_v49 = vld [vmem:[#allocation14 + $0x118] sm:$0xff]  ;;  %v1616_v54 = vld [vmem:[#allocation14 + $0x128] sm:$0xff] }
 0x1ce   : > { %v804_v0 = vld [vmem:[#allocation2 + $0x4] sm:$0x3]  ;;  %v919_v1 = vcombine.low %v802_v62, %v803_v63  ;;  %v806_v4 = vld [vmem:[#allocation2 + $0x8] sm:$0x3]  ;;  %v1520_v62 = vld [vmem:[#allocation14 + $0x38] sm:$0xff]  ;;  %v2452_v63 = vpack.c.bf16 %v1425_v60, %v1424_v59 }
 0x1cf   : > { %v1615_v53 = vld [vmem:[#allocation14 + $0x120] sm:$0xff]  ;;  %v1617_v60 = vld [vmem:[#allocation14 + $0x130] sm:$0xff] }
 0x1d0   : > { %v805_v3 = vld [vmem:[#allocation2 + $0x6] sm:$0x3]  ;;  %v927_v10 = vrot.slane %v919_v1, %v926_v2  ;;  %v2512_v59 = vpack.c.bf16 %v1616_v54, %v1615_v53 }
 0x1d1   : > { %v807_v5 = vld [vmem:[#allocation2 + $0xa] sm:$0x3]  ;;  %v920_v6 = vcombine.low %v804_v0, %v805_v3  ;;  %v808_v8 = vld [vmem:[#allocation2 + $0xc] sm:$0x3]  ;;  %v2484_v0 = vpack.c.bf16 %v1520_v62, %v1519_v61  ;;  %v1426_v1 = vld [vmem:[#allocation14 + $0xc0] sm:$0xff] }
 0x1d2   : > { %v936_v7 = vcombine.low %v806_v4, %v807_v5  ;;  %v809_v9 = vld [vmem:[#allocation2 + $0xe] sm:$0x3]  ;;  %v1521_v4 = vld [vmem:[#allocation14 + $0x40] sm:$0xff]  ;;  %v1618_v61 = vld [vmem:[#allocation14 + $0x138] sm:$0xff] }
 0x1d3   : > { %v934_v11 = vrot.slane %v920_v6, %v926_v2  ;;  %v937_v12 = vcombine.low %v808_v8, %v809_v9  ;;  %v1522_v5 = vld [vmem:[#allocation14 + $0x48] sm:$0xff]  ;;  %v1429_v8 = vld [vmem:[#allocation14 + $0xd8] sm:$0xff]  ;;  %v2516_v62 = vpack.c.bf16 %v1618_v61, %v1617_v60 }
 0x1d4   : > { %v944_v19 = vrot.slane %v936_v7, %v926_v2  ;;  %v2488_v6 = vpack.c.bf16 %v1522_v5, %v1521_v4  ;;  %v1428_v7 = vld [vmem:[#allocation14 + $0xd0] sm:$0xff]  ;;  %v1623_v5 = vld [vmem:[#allocation14 + $0x160] sm:$0xff] }
 0x1d5   : > { %v935_v16 = vcombine.low %v927_v10, %v934_v11  ;;  %v951_v20 = vrot.slane %v937_v12, %v926_v2  ;;  %v1427_v2 = vld [vmem:[#allocation14 + $0xc8] sm:$0xff]  ;;  %v2460_v9 = vpack.c.bf16 %v1429_v8, %v1428_v7  ;;  %v1523_v10 = vld [vmem:[#allocation14 + $0x50] sm:$0xff]  ;;  %v1524_v11 = vld [vmem:[#allocation14 + $0x58] sm:$0xff] }
 0x1d6   : > { %v2456_v3 = vpack.c.bf16 %v1427_v2, %v1426_v1  ;;  %v2492_v12 = vpack.c.bf16 %v1524_v11, %v1523_v10  ;;  %v1621_v2 = vld [vmem:[#allocation14 + $0x150] sm:$0xff] }
 0x1d7   : > { %2136 = vmatprep.mubr.msk.f32.mxu0 %vm516_vm1, %v935_v16  ;;  %2174 = vmatprep.mubr.msk.f32.mxu1 %vm516_vm1, %v935_v16  ;;  %v952_v21 = vcombine.low %v944_v19, %v951_v20  ;;  %v2464_v19 = vpack.c.bf16 %v1431_v14, %v1430_v13  ;;  %v1526_v20 = vld [vmem:[#allocation14 + $0x68] sm:$0xff]  ;;  %v1625_v8 = vld [vmem:[#allocation14 + $0x170] sm:$0xff] }
 0x1d9   : > { %2137 = vmatmul.mubr.msk.f32.vlgmr.msra.gmra.mrb[2].mxu0 %vm516_vm1, %v952_v21  ;;  %2175 = vmatmul.mubr.msk.f32.vlgmr.msra.gmra.mrb[2].mxu1 %vm516_vm1, %v952_v21  ;;  %v1310_v34 = vrot.slane %v952_v21, 1  ;;  %v1432_v21 = vld [vmem:[#allocation14 + $0xf0] sm:$0xff] }
 0x1da   : > { %2411 = vmatpush3.bf16.msra.mxu0 %v3295_v15  ;;  %2193 = vmatprep.mubr.msk.f32.mxu0 %vm516_vm1, %v3302_v18  ;;  %v1309_v15 = vrot.slane %v935_v16, 1  ;;  %v1213_v18 = vld [vmem:[#allocation11 + $0xa0] sm:$0xff] }
 0x1db   : > { %2413 = vmatprep.subr.bf16.mxu0 %v2412_v22  ;;  %v2432_v38 = vpack.c.bf16 %v1214_v36, %v1213_v18  ;;  %2443 = vmatpush3.bf16.msra.mxu1 %v2440_v43  ;;  %v1525_v16 = vld [vmem:[#allocation14 + $0x60] sm:$0xff] }
 0x1dc   : > { %v1311_v37 = vsel %vm1226_vm2, %v1309_v15, %v1310_v34  ;;  %2445 = vmatprep.subr.bf16.mxu1 %v2444_v48  ;;  %v2496_v23 = vpack.c.bf16 %v1526_v20, %v1525_v16 }
 0x1de   : > { %2415 = vmatpush3.bf16.msra.mxu0 %v2412_v22  ;;  %v1433_v22 = vld [vmem:[#allocation14 + $0xf8] sm:$0xff] }
 0x1df   : > { %2417 = vmatprep.subr.bf16.mxu0 %v2416_v25  ;;  %2447 = vmatpush3.bf16.msra.mxu1 %v2444_v48  ;;  %v2468_v24 = vpack.c.bf16 %v1433_v22, %v1432_v21  ;;  %v1613_v48 = vld [vmem:[#allocation14 + $0x110] sm:$0xff] }
 0x1e0   : > { %2449 = vmatprep.subr.bf16.mxu1 %v2448_v56 }
 0x1e2   : > { %2419 = vmatpush3.bf16.msra.mxu0 %v2416_v25  ;;  %v1527_v25 = vld [vmem:[#allocation14 + $0x70] sm:$0xff] }
 0x1e3   : > { %2421 = vmatprep.subr.bf16.mxu0 %v2420_v28  ;;  %2451 = vmatpush3.bf16.msra.mxu1 %v2448_v56  ;;  %v2500_v27 = vpack.c.bf16 %v1528_v26, %v1527_v25 }
 0x1e4   : > { %2453 = vmatprep.subr.bf16.mxu1 %v2452_v63 }
 0x1e6   : > { %2423 = vmatpush3.bf16.msra.mxu0 %v2420_v28  ;;  %v1611_v28 = vld [vmem:[#allocation14 + $0x100] sm:$0xff] }
 0x1e7   : > { %2425 = vmatprep.subr.bf16.mxu0 %v2424_v31  ;;  %2455 = vmatpush3.bf16.msra.mxu1 %v2452_v63  ;;  %v2504_v30 = vpack.c.bf16 %v1612_v29, %v1611_v28  ;;  %v1619_v63 = vld [vmem:[#allocation14 + $0x140] sm:$0xff] }
 0x1e8   : > { %2457 = vmatprep.subr.bf16.mxu1 %v2456_v3  ;;  %v1923_v29 = vld [vmem:[%s3450_s13] ss:$0 sm:$0xff] }
 0x1e9   : > { %2194 = vmatmul.mubr.msk.f32.vlgmr.msra.gmra.mrb[4].mxu0 %vm516_vm1, %v1228_v17  ;;  %v1513_v17 = vld [vmem:[#allocation14] sm:$0xff] }
 0x1ea   : > { %2427 = vmatpush3.bf16.msra.mxu0 %v2424_v31  ;;  %2212 = vmatprep.mubr.msk.f32.mxu0 %vm516_vm1, %v1311_v37  ;;  %v2472_v47 = vpack.c.bf16 %v1514_v44, %v1513_v17  ;;  %v1921_v17 = vld [vmem:[%s3408_s7] ss:$0 sm:$0xff] }
 0x1eb   : > { %2429 = vmatprep.subr.bf16.mxu0 %v2428_v35  ;;  %2459 = vmatpush3.bf16.msra.mxu1 %v2456_v3  ;;  %v1622_v3 = vld [vmem:[#allocation14 + $0x158] sm:$0xff] }
 0x1ec   : > { %2461 = vmatprep.subr.bf16.mxu1 %v2460_v9  ;;  %v2524_v4 = vpack.c.bf16 %v1622_v3, %v1621_v2 }
 0x1ee   : > { %2431 = vmatpush3.bf16.msra.mxu0 %v2428_v35 }
 0x1ef   : > { %2433 = vmatprep.subr.bf16.mxu0 %v2432_v38  ;;  %2463 = vmatpush3.bf16.msra.mxu1 %v2460_v9  ;;  %v1626_v9 = vld [vmem:[#allocation14 + $0x178] sm:$0xff] }
 0x1f0   : > { %2465 = vmatprep.subr.bf16.mxu1 %v2464_v19  ;;  %v2532_v10 = vpack.c.bf16 %v1626_v9, %v1625_v8 }
 0x1f2   : > { %2435 = vmatpush3.bf16.msra.mxu0 %v2432_v38 }
 0x1f3   : > { %2437 = vmatprep.subr.bf16.mxu0 %v2436_v41  ;;  %2467 = vmatpush3.bf16.msra.mxu1 %v2464_v19 }
 0x1f4   : > { %2469 = vmatprep.subr.bf16.mxu1 %v2468_v24 }
 0x1f6   : > { %2439 = vmatpush3.bf16.msra.mxu0 %v2436_v41 }
 0x1f7   : > { %2473 = vmatprep.subr.bf16.mxu0 %v2472_v47  ;;  %2471 = vmatpush3.bf16.msra.mxu1 %v2468_v24 }
 0x1f8   : > { %2505 = vmatprep.subr.bf16.mxu1 %v2504_v30 }
 0x1f9   : > { %2213 = vmatmul.mubr.msk.f32.vlgmr.msra.gmra.mrb[4].mxu0 %vm516_vm1, %v1310_v34 }
 0x1fa   : > { %2475 = vmatpush3.bf16.msra.mxu0 %v2472_v47 }
 0x1fb   : > { %2477 = vmatprep.subr.bf16.mxu0 %v2476_v52 }
 0x1fe   : > { %2479 = vmatpush3.bf16.msra.mxu0 %v2476_v52  ;;  %v2508_v52 = vpack.c.bf16 %v1614_v49, %v1613_v48 }
 0x1ff   : > { %2481 = vmatprep.subr.bf16.mxu0 %v2480_v57 }
 0x202   : > { %2483 = vmatpush3.bf16.msra.mxu0 %v2480_v57 }
 0x203   : > { %2485 = vmatprep.subr.bf16.mxu0 %v2484_v0 }
 0x206   : > { %2487 = vmatpush3.bf16.msra.mxu0 %v2484_v0  ;;  %v1620_v0 = vld [vmem:[#allocation14 + $0x148] sm:$0xff] }
 0x207   : > { %2489 = vmatprep.subr.bf16.mxu0 %v2488_v6  ;;  %v2520_v1 = vpack.c.bf16 %v1620_v0, %v1619_v63 }
 0x20a   : > { %2491 = vmatpush3.bf16.msra.mxu0 %v2488_v6  ;;  %v1624_v6 = vld [vmem:[#allocation14 + $0x168] sm:$0xff] }
 0x20b   : > { %2493 = vmatprep.subr.bf16.mxu0 %v2492_v12  ;;  %v2528_v7 = vpack.c.bf16 %v1624_v6, %v1623_v5 }
 0x20e   : > { %2495 = vmatpush3.bf16.msra.mxu0 %v2492_v12 }
 0x20f   : > { %2497 = vmatprep.subr.bf16.mxu0 %v2496_v23 }
 0x212   : > { %2499 = vmatpush3.bf16.msra.mxu0 %v2496_v23 }
 0x213   : > { %2501 = vmatprep.subr.bf16.mxu0 %v2500_v27 }
 0x216   : > { %2503 = vmatpush3.bf16.msra.mxu0 %v2500_v27  ;;  %v1922_v27 = vld [vmem:[%s3449_s4] ss:$0 sm:$0xff] }
 0x2ac   : > { %v2138_v31 = vpop.f32.mrb[2].mxu0  ;;  %v2176_v32 = vpop.f32.mrb[2].mxu1 }
 0x2ad   : > { %1033 = vst [vmem:[#allocation3 + $0x8] sm:$0xff] %v2138_v31  ;;  %v1023_v33 = vpop.f32.mrb[3].mxu0  ;;  %v1193_v34 = vpop.f32.mrb[3].mxu1 }
 0x2ae   : > { %1032 = vst [vmem:[#allocation3] sm:$0xff] %v1023_v33 }
 0x2b4   : > { %v1035_v15 = vld [vmem:[#allocation3 + $0x9] sm:$0x7f] }
 0x2b5   : > { %v1203_v35 = vadd.f32 %v2176_v32, %v1035_v15  ;;  %v1034_v18 = vld [vmem:[#allocation3 + $0x1] sm:$0xff] }
 0x2b6   : > { %v1202_v36 = vadd.f32 %v1193_v34, %v1034_v18 }
 0x2b7   : > { %1205 = vst [vmem:[#allocation3 + $0x9] sm:$0x7f] %v1203_v35 }
 0x2b8   : > { %1204 = vst [vmem:[#allocation3 + $0x1] sm:$0xff] %v1202_v36 }
 0x2bf   : > { %v1207_v37 = vld [vmem:[#allocation3 + $0x8] sm:$0x7f]  ;;  %v1206_v40 = vld [vmem:[#allocation3] sm:$0xff] }
 0x2cc   : > { %v2214_v38 = vpop.f32.mrb[4].mxu0 }
 0x2cd   : > { %v1392_v39 = vadd.f32 %v2214_v38, %v1207_v37  ;;  %v1382_v41 = vpop.f32.mrb[5].mxu0 }
 0x2ce   : > { %v1391_v42 = vadd.f32 %v1382_v41, %v1206_v40 }
 0x2cf   : > { %1394 = vst [vmem:[#allocation3 + $0x8] sm:$0x7f] %v1392_v39 }
 0x2d0   : > { %1393 = vst [vmem:[#allocation3] sm:$0xff] %v1391_v42  ;;  %v1404_v43 = vmul.f32 %v1920_v58, %v1391_v42 }
 0x2d2   : > { %v1413_v44 = vadd.f32 %v1921_v17, %v1404_v43 }
 0x2d4   : > { %v1415_v45 = vmax.f32 %v1413_v44, 0.0 }
 0x2d6   : > { %v1396_v46 = vld [vmem:[#allocation3 + $0x8] sm:$0xff]  ;;  %2247 = vmatprep.mubr.f32.mxu1 %v1415_v45  ;;  %2282 = vmatprep.mubr.f32.mxu0 %v1415_v45  ;;  %v1629_v55 = vrot.slane %v1415_v45, 1 }
 0x2d7   : > { %v1405_v47 = vmul.f32 %v1920_v58, %v1396_v46 }
 0x2d9   : > { %v1414_v50 = vadd.f32 %v1921_v17, %v1405_v47 }
 0x2db   : > { %v1416_v51 = vmax.f32 %v1414_v50, 0.0 }
 0x2dd   : > { %2248 = vmatmul.mubr.f32.vlgmr.msra.gmra.mrb[4].mxu1 %v1416_v51  ;;  %2283 = vmatmul.mubr.f32.vlgmr.msra.gmra.mrb[6].mxu0 %v1416_v51  ;;  %v1630_v56 = vrot.slane %v1416_v51, 1 }
 0x2de   : > { %2507 = vmatpush3.bf16.msra.mxu1 %v2504_v30 }
 0x2df   : > { %v1631_v57 = vsel %vm1226_vm2, %v1629_v55, %v1630_v56  ;;  %2509 = vmatprep.subr.bf16.mxu1 %v2508_v52 }
 0x2e0   : > { %2317 = vmatprep.mubr.f32.mxu1 %v1631_v57 }
 0x2e2   : > { %2511 = vmatpush3.bf16.msra.mxu1 %v2508_v52 }
 0x2e3   : > { %2513 = vmatprep.subr.bf16.mxu1 %v2512_v59 }
 0x2e6   : > { %2515 = vmatpush3.bf16.msra.mxu1 %v2512_v59 }
 0x2e7   : > { %2517 = vmatprep.subr.bf16.mxu1 %v2516_v62 }
 0x2ea   : > { %2519 = vmatpush3.bf16.msra.mxu1 %v2516_v62 }
 0x2eb   : > { %2521 = vmatprep.subr.bf16.mxu1 %v2520_v1 }
 0x2ee   : > { %2523 = vmatpush3.bf16.msra.mxu1 %v2520_v1 }
 0x2ef   : > { %2525 = vmatprep.subr.bf16.mxu1 %v2524_v4 }
 0x2f2   : > { %2527 = vmatpush3.bf16.msra.mxu1 %v2524_v4 }
 0x2f3   : > { %2529 = vmatprep.subr.bf16.mxu1 %v2528_v7 }
 0x2f6   : > { %2531 = vmatpush3.bf16.msra.mxu1 %v2528_v7 }
 0x2f7   : > { %2533 = vmatprep.subr.bf16.mxu1 %v2532_v10 }
 0x2fa   : > { %2535 = vmatpush3.bf16.msra.mxu1 %v2532_v10 }
 0x2fd   : > { %2318 = vmatmul.mubr.f32.vlgmr.msra.gmra.mrb[6].mxu1 %v1630_v56 }
 0x3b0   : > { %v2249_v11 = vpop.f32.mrb[4].mxu1  ;;  %v2284_v12 = vpop.f32.mrb[6].mxu0 }
 0x3b1   : > { %1510 = vst [vmem:[#allocation4 + $0x8] sm:$0xff] %v2249_v11  ;;  %v1500_v13 = vpop.f32.mrb[5].mxu1  ;;  %v1595_v14 = vpop.f32.mrb[7].mxu0 }
 0x3b2   : > { %1509 = vst [vmem:[#allocation4] sm:$0xff] %v1500_v13 }
 0x3b8   : > { %v1512_v16 = vld [vmem:[#allocation4 + $0x9] sm:$0x7f] }
 0x3b9   : > { %v1605_v19 = vadd.f32 %v2284_v12, %v1512_v16  ;;  %v1511_v20 = vld [vmem:[#allocation4 + $0x1] sm:$0xff] }
 0x3ba   : > { %v1604_v21 = vadd.f32 %v1595_v14, %v1511_v20 }
 0x3bb   : > { %1607 = vst [vmem:[#allocation4 + $0x9] sm:$0x7f] %v1605_v19 }
 0x3bc   : > { %1606 = vst [vmem:[#allocation4 + $0x1] sm:$0xff] %v1604_v21 }
 0x3c3   : > { %v1609_v22 = vld [vmem:[#allocation4 + $0x8] sm:$0x7f]  ;;  %v1608_v25 = vld [vmem:[#allocation4] sm:$0xff] }
 0x3d0   : > { %v2319_v23 = vpop.f32.mrb[6].mxu1 }
 0x3d1   : > { %v1710_v24 = vadd.f32 %v2319_v23, %v1609_v22  ;;  %v1700_v26 = vpop.f32.mrb[7].mxu1 }
 0x3d2   : > { %v1709_v28 = vadd.f32 %v1700_v26, %v1608_v25 }
 0x3d3   : > { %1712 = vst [vmem:[#allocation4 + $0x8] sm:$0x7f] %v1710_v24 }
 0x3d4   : > { %1711 = vst [vmem:[#allocation4] sm:$0xff] %v1709_v28  ;;  %v1722_v30 = vmul.f32 %v1922_v27, %v1709_v28 }
 0x3d6   : > { %v1731_v31 = vadd.f32 %v1923_v29, %v1722_v30 }
 0x3d8   : > { %v1733_v32 = vmax.f32 %v1731_v31, 0.0 }
 0x3da   : > { %v1714_v33 = vld [vmem:[#allocation4 + $0x8] sm:$0xff]  ;;  %1735 = vst [vmem:[%s499_s0] sm:$0xff] %v1733_v32 }
 0x3db   : > { %v1723_v34 = vmul.f32 %v1922_v27, %v1714_v33 }
 0x3dd   : > { %v1732_v15 = vadd.f32 %v1923_v29, %v1723_v34 }
 0x3df   : > { %v1734_v35 = vmax.f32 %v1732_v15, 0.0 }
 0x3e1   : > { %1736 = vst [vmem:[%s499_s0 + $0x8] sm:$0xff] %v1734_v35 }
 0x3e2   : > { %2828 = shalt.err (!%p2825_p1)
}
 0x3e3   : > { %s2829_s5 = scalar_lea.hbm %s3355_s29, 256  ;;  %s2833_s27 = scalar_lea.hbm %s3451_s22, 512 }
 0x3e4   : > { %p2830_p11 = scmp.ne.s32.totalorder %s3355_s29, %s2829_s5  ;;  %p2834_p3 = scmp.lt.u32.totalorder %s3355_s29, %s3451_s22 }
 0x3e5   : > { %p2835_p13 = scmp.lt.u32.totalorder %s2833_s27, %s2829_s5  ;;  %p2837_p6 = scmp.lt.u32.totalorder %s2829_s5, %s3355_s29 }
 0x3e6   : > { %p2831_p8 = pnand %p2830_p11, %p3452_p2 }
 0x3e7   : > { %p2836_p0 = por %p2835_p13, %p2834_p3 }
 0x3e8   : > { %p2832_p12 = pneg %p2831_p8 }
 0x3e9   : > { %p2838_p4 = por %p2837_p6, %p2836_p0 }
 0x3eb   : > { %p2839_p10 = pnand %p2838_p4, %p2832_p12 }
 0x3ed   : > { %2842 = shalt.err (!%p2839_p10)
}
 0x3ee   : > { %s2913_s30 = smov 128   ;;  %s2914_s11 = smov 8  }
 0x3ef   : > { %2562 = dma.vmem_to_hbm [thread:$0]  (%p3452_p2), %s3357_s15, 256, %s3355_s29, %s1738_s10, %s2913_s30, %s2913_s30, %s2914_s11  }
 0x3f0 PF: > { %s1766_s9 = sand.u32 1, %s2885_s17   ;;  %p3453_p5 = scmp.ne.s32.totalorder %s3436_s28, 0 }
 0x3f1   : > { %p3454_p7 = scmp.ge.s32.totalorder %s2897_s20, 2  ;;  %s1767_s26 = scalar_lea.sflag [#allocation7], %s1766_s9 }
 0x3f3   : > { %p2585_p9 = pnand %p3454_p7, %p3453_p5 }
 0x3f5   : > { %2880 = dma.done.wait (!%p2585_p9), %s1767_s26, 256  }
 0x3f6   : > { %2882 = vsyncadd (!%p2585_p9), %s1767_s26, 4294967040  ;;  %p29_p1 = scmp.ge.s32.totalorder %s3127_s16, 4   ;;  %s3455_s17 = smov %s2889_s18 }
 0x3f7   : > { %s3456_s18 = smov %s2893_s19  ;;  %s3457_s19 = smov %s3138_s14 }
 0x3f8   : > { %s3458_s20 = smov %s3127_s16  ;;  %31 = sbr.rel (!%p29_p1) target bundleno = 17 (0x11), region = 145 }
 0x3ff   :  { %1772 = vsyncpa [#allocation6], 1 }
 0x400   :  { %1774 = vsyncpa [#allocation6 + $0x1], 1 }
 0x401   :  { %1775 = vsyncpa [#allocation9], 1 }
 0x402   :  { %1777 = vsyncpa [#allocation9 + $0x1], 1 }
 0x403   :  { %1778 = vsyncpa [#allocation12], 1 }
 0x404   :  { %1779 = vsyncpa [#allocation15], 1 }
 0x405   :  { %1780 = vsyncpa [#allocation7], 1 }
 0x406   :  { %1782 = vsyncpa [#allocation7 + $0x1], 1 }

</bundles_post_ra>
